<compile_context>
chip_gen: v7x
topology: tpu7x:2x2x1
jax: 0.10.0
libtpu: 0.0.40
codegen_flags: <defaults>
</compile_context>

<pallas_src>
import functools
import math

import jax
import jax.numpy as jnp
from jax.experimental import pallas as pl
from jax.experimental.pallas import tpu as pltpu


def _layernorm(x, gamma, beta, eps=1e-5):
    mu = jnp.mean(x, axis=-1, keepdims=True)
    var = jnp.mean((x - mu) ** 2, axis=-1, keepdims=True)
    return (x - mu) * jax.lax.rsqrt(var + eps) * gamma + beta


def _reciprocal_attention_kernel(tcr_ref, pep_ref, w_t2p_ref, w_p2t_ref, vec_ref,
                                 tcr_out_ref, pep_out_ref, *,
                                 num_heads, matmul_dtype, approx_recip):
    # Refs per grid step (one step = block_batch batch elements, both dirs):
    #   tcr_ref : (Bb, Lt, E)   pep_ref : (Bb, Lp, E)
    #   w_*_ref : (4, E, E)     rows = [Wq, Wk, Wv, Wo], each stored [in, out]
    #   vec_ref : (16, E) f32   rows 0..5  = t2p {bq, bk, bv, bo, ln_g, ln_b}
    #                           rows 8..13 = p2t {bq, bk, bv, bo, ln_g, ln_b}
    tcr = tcr_ref[...].astype(jnp.float32)
    pep = pep_ref[...].astype(jnp.float32)
    Bb, _, E = tcr.shape
    head_dim = E // num_heads
    scale = 1.0 / math.sqrt(head_dim)

    def cross_attn(xq, xkv, w_ref, row0):
        Lq = xq.shape[1]
        Lk = xkv.shape[1]
        wq, wk, wv, wo = w_ref[0], w_ref[1], w_ref[2], w_ref[3]
        bq = vec_ref[row0 + 0:row0 + 1, :]
        bk = vec_ref[row0 + 1:row0 + 2, :]
        bv = vec_ref[row0 + 2:row0 + 3, :]
        bo = vec_ref[row0 + 3:row0 + 4, :]
        ln_g = vec_ref[row0 + 4:row0 + 5, :]
        ln_b = vec_ref[row0 + 5:row0 + 6, :]

        # Projections as flat 2-D matmuls (Bb*L, E) @ (E, E): MXU operands in
        # matmul_dtype (bf16 by default), f32 accumulation, f32 bias add.
        xq2 = xq.reshape(Bb * Lq, E).astype(matmul_dtype)
        xk2 = xkv.reshape(Bb * Lk, E).astype(matmul_dtype)
        q = jnp.dot(xq2, wq, preferred_element_type=jnp.float32) + bq
        k = jnp.dot(xk2, wk, preferred_element_type=jnp.float32) + bk
        v = jnp.dot(xk2, wv, preferred_element_type=jnp.float32) + bv

        # Fold the softmax scale into q once (not into every (Lq,Lk) tile).
        q3 = (q * scale).reshape(Bb, Lq, E).astype(matmul_dtype)
        # Transpose K once per direction -> (Bb, E, Lk); per-head score matmuls
        # then contract lhs-last / rhs-sublane with no extra transposes.
        kT = jnp.swapaxes(k.reshape(Bb, Lk, E), 1, 2).astype(matmul_dtype)
        v3 = v.reshape(Bb, Lk, E).astype(matmul_dtype)

        # Fused output projection: one (Bb*Lq, E) accumulator, no concat.
        out = jnp.zeros((Bb * Lq, E), jnp.float32)
        for h in range(num_heads):                       # static unroll
            sl = slice(h * head_dim, (h + 1) * head_dim)
            s = jnp.einsum('bqd,bdk->bqk', q3[:, :, sl], kT[:, sl, :],
                           preferred_element_type=jnp.float32)
            s = s - jnp.max(s, axis=-1, keepdims=True)
            p = jnp.exp(s)
            denom = jnp.sum(p, axis=-1, keepdims=True)
            p = p * pl.reciprocal(denom, approx=approx_recip)  # EUP divide
            ctx = jnp.einsum('bqk,bkd->bqd', p.astype(matmul_dtype),
                             v3[:, :, sl], preferred_element_type=jnp.float32)
            out = out + jnp.dot(
                ctx.reshape(Bb * Lq, head_dim).astype(matmul_dtype),
                wo[sl, :], preferred_element_type=jnp.float32)

        attn = out + bo
        resid = xq.reshape(Bb * Lq, E) + attn   # residual dropout = identity (eval)
        y = _layernorm(resid, ln_g, ln_b)
        return y.reshape(Bb, Lq, E)

    tcr_out_ref[...] = cross_attn(tcr, pep, w_t2p_ref, 0).astype(tcr_out_ref.dtype)
    pep_out_ref[...] = cross_attn(pep, tcr, w_p2t_ref, 8).astype(pep_out_ref.dtype)


def _pick_block_batch(batch):
    # Amortize per-grid-step overhead over several batch elements, but keep
    # >= 2 grid steps when possible so both v7x TensorCores get work.
    for bb in (8, 4, 2, 1):
        if batch % bb == 0 and batch // bb >= 2:
            return bb
    return batch


def reciprocal_attention_forward(tcr_emb, peptide_emb, params, *, num_heads,
                                 block_batch=None,
                                 matmul_dtype=jnp.bfloat16,
                                 out_dtype=None,
                                 approx_recip=True):
    """tcr_emb: [B, Lt, E], peptide_emb: [B, Lp, E] -> (tcr_out, peptide_out)."""
    B, Lt, E = tcr_emb.shape
    Bp, Lp, Ep = peptide_emb.shape
    assert B == Bp and E == Ep and E % num_heads == 0
    if out_dtype is None:
        out_dtype = tcr_emb.dtype          # downstream may prefer bf16 outputs
    if block_batch is None:
        block_batch = _pick_block_batch(B)
    assert B % block_batch == 0

    # Packed constants: weights in matmul_dtype, biases/LN params in f32.
    w_t2p = jnp.stack([params["t2p"]["wq"], params["t2p"]["wk"],
                       params["t2p"]["wv"], params["t2p"]["wo"]]).astype(matmul_dtype)
    w_p2t = jnp.stack([params["p2t"]["wq"], params["p2t"]["wk"],
                       params["p2t"]["wv"], params["p2t"]["wo"]]).astype(matmul_dtype)

    vec = jnp.zeros((16, E), jnp.float32)
    vec = vec.at[0].set(params["t2p"]["bq"]).at[1].set(params["t2p"]["bk"])
    vec = vec.at[2].set(params["t2p"]["bv"]).at[3].set(params["t2p"]["bo"])
    vec = vec.at[4].set(params["ln_tcr_g"]).at[5].set(params["ln_tcr_b"])
    vec = vec.at[8].set(params["p2t"]["bq"]).at[9].set(params["p2t"]["bk"])
    vec = vec.at[10].set(params["p2t"]["bv"]).at[11].set(params["p2t"]["bo"])
    vec = vec.at[12].set(params["ln_pep_g"]).at[13].set(params["ln_pep_b"])

    kernel = functools.partial(_reciprocal_attention_kernel,
                               num_heads=num_heads,
                               matmul_dtype=matmul_dtype,
                               approx_recip=approx_recip)

    return pl.pallas_call(
        kernel,
        out_shape=(jax.ShapeDtypeStruct((B, Lt, E), out_dtype),
                   jax.ShapeDtypeStruct((B, Lp, E), out_dtype)),
        grid_spec=pltpu.PrefetchScalarGridSpec(
            num_scalar_prefetch=0,
            grid=(B // block_batch,),
            in_specs=[
                pl.BlockSpec((block_batch, Lt, E), lambda b: (b, 0, 0)),  # tcr
                pl.BlockSpec((block_batch, Lp, E), lambda b: (b, 0, 0)),  # pep
                pl.BlockSpec((4, E, E), lambda b: (0, 0, 0)),   # t2p weights (invariant)
                pl.BlockSpec((4, E, E), lambda b: (0, 0, 0)),   # p2t weights (invariant)
                pl.BlockSpec((16, E), lambda b: (0, 0)),        # biases + LN params
            ],
            out_specs=[
                pl.BlockSpec((block_batch, Lt, E), lambda b: (b, 0, 0)),
                pl.BlockSpec((block_batch, Lp, E), lambda b: (b, 0, 0)),
            ],
        ),
        compiler_params=pltpu.CompilerParams(
            dimension_semantics=("parallel",),
            vmem_limit_bytes=32 * 1024 * 1024),
    )(tcr_emb, peptide_emb, w_t2p, w_p2t, vec)


def init_params(key, embed_dim):
    """Deterministic synthetic init (weights stored [in, out] so y = x @ W + b)."""
    k_t2p, k_p2t, k_ln = jax.random.split(key, 3)
    scale = 1.0 / math.sqrt(embed_dim)

    def mha_params(k):
        ks = jax.random.split(k, 8)
        w = lambda kk: jax.random.normal(kk, (embed_dim, embed_dim), jnp.float32) * scale
        b = lambda kk: 0.1 * jax.random.normal(kk, (embed_dim,), jnp.float32)
        return dict(wq=w(ks[0]), wk=w(ks[1]), wv=w(ks[2]), wo=w(ks[3]),
                    bq=b(ks[4]), bk=b(ks[5]), bv=b(ks[6]), bo=b(ks[7]))

    kl = jax.random.split(k_ln, 4)
    return dict(
        t2p=mha_params(k_t2p),
        p2t=mha_params(k_p2t),
        ln_tcr_g=1.0 + 0.05 * jax.random.normal(kl[0], (embed_dim,), jnp.float32),
        ln_tcr_b=0.05 * jax.random.normal(kl[1], (embed_dim,), jnp.float32),
        ln_pep_g=1.0 + 0.05 * jax.random.normal(kl[2], (embed_dim,), jnp.float32),
        ln_pep_b=0.05 * jax.random.normal(kl[3], (embed_dim,), jnp.float32),
    )


# ----------------------------- pure-JAX reference -----------------------------
def _mha_ref(xq, xkv, p, num_heads):
    hp = jax.lax.Precision.HIGHEST
    B, Lq, E = xq.shape
    Lk = xkv.shape[1]
    dh = E // num_heads
    q = jnp.einsum('ble,ef->blf', xq, p["wq"], precision=hp) + p["bq"]
    k = jnp.einsum('ble,ef->blf', xkv, p["wk"], precision=hp) + p["bk"]
    v = jnp.einsum('ble,ef->blf', xkv, p["wv"], precision=hp) + p["bv"]
    q = q.reshape(B, Lq, num_heads, dh)
    k = k.reshape(B, Lk, num_heads, dh)
    v = v.reshape(B, Lk, num_heads, dh)
    s = jnp.einsum('bqhd,bkhd->bhqk', q, k, precision=hp) / math.sqrt(dh)
    a = jax.nn.softmax(s, axis=-1)
    o = jnp.einsum('bhqk,bkhd->bqhd', a, v, precision=hp).reshape(B, Lq, E)
    return jnp.einsum('ble,ef->blf', o, p["wo"], precision=hp) + p["bo"]


def reference_forward(tcr, pep, params, num_heads):
    t2p = _mha_ref(tcr, pep, params["t2p"], num_heads)
    tcr_out = _layernorm(tcr + t2p, params["ln_tcr_g"], params["ln_tcr_b"])
    p2t = _mha_ref(pep, tcr, params["p2t"], num_heads)
    pep_out = _layernorm(pep + p2t, params["ln_pep_g"], params["ln_pep_b"])
    return tcr_out, pep_out


if __name__ == "__main__":
    key = jax.random.PRNGKey(0)
    k_t, k_p, k_par = jax.random.split(key, 3)

    batch, len_tcr, len_pep, embed_dim, num_heads = 4, 16, 8, 32, 4
    tcr = jax.random.normal(k_t, (batch, len_tcr, embed_dim), jnp.float32)
    pep = jax.random.normal(k_p, (batch, len_pep, embed_dim), jnp.float32)
    params = init_params(k_par, embed_dim)

    tcr_ref, pep_ref = reference_forward(tcr, pep, params, num_heads)

    # 1) Exact-precision path (f32 MXU operands, exact reciprocal): tight check.
    tcr_f32, pep_f32 = reciprocal_attention_forward(
        tcr, pep, params, num_heads=num_heads,
        matmul_dtype=jnp.float32, approx_recip=False)
    tcr_f32, pep_f32 = jax.block_until_ready((tcr_f32, pep_f32))
    assert tcr_f32.shape == (batch, len_tcr, embed_dim)
    assert pep_f32.shape == (batch, len_pep, embed_dim)
    assert jnp.allclose(tcr_f32, tcr_ref, atol=5e-3, rtol=5e-3)
    assert jnp.allclose(pep_f32, pep_ref, atol=5e-3, rtol=5e-3)

    # 2) Default fast path (bf16 MXU operands + EUP approx reciprocal).
    tcr_out, pep_out = reciprocal_attention_forward(
        tcr, pep, params, num_heads=num_heads)
    tcr_out, pep_out = jax.block_until_ready((tcr_out, pep_out))
    assert jnp.allclose(tcr_out, tcr_ref, atol=3e-2, rtol=3e-2)
    assert jnp.allclose(pep_out, pep_ref, atol=3e-2, rtol=3e-2)

    print("KERNEL_OK")
</pallas_src>

<mosaic_0001>
module attributes {stable_mosaic.version = 11 : i64} {
  func.func @_reciprocal_attention_kernel(%arg0: i32, %arg1: memref<2x16x32xf32, #tpu.memory_space<vmem>>, %arg2: memref<2x8x32xf32, #tpu.memory_space<vmem>>, %arg3: memref<4x32x32xf32, #tpu.memory_space<vmem>>, %arg4: memref<4x32x32xf32, #tpu.memory_space<vmem>>, %arg5: memref<16x32xf32, #tpu.memory_space<vmem>>, %arg6: memref<2x16x32xf32, #tpu.memory_space<vmem>>, %arg7: memref<2x8x32xf32, #tpu.memory_space<vmem>>) attributes {dimension_semantics = [#tpu.dimension_semantics<parallel>], iteration_bounds = array<i64: 2>, scalar_prefetch = 0 : i64, scratch_operands = 0 : i64, tpu.core_type = #tpu.core_type<tc>, window_params = [{transform_indices = @transform_0, window_bounds = array<i64: 2, 16, 32>}, {transform_indices = @transform_1, window_bounds = array<i64: 2, 8, 32>}, {pipeline_mode = #tpu.pipeline_mode<synchronous>, transform_indices = @transform_2, window_bounds = array<i64: 4, 32, 32>}, {pipeline_mode = #tpu.pipeline_mode<synchronous>, transform_indices = @transform_3, window_bounds = array<i64: 4, 32, 32>}, {pipeline_mode = #tpu.pipeline_mode<synchronous>, transform_indices = @transform_4, window_bounds = array<i64: 16, 32>}, {transform_indices = @transform_5, window_bounds = array<i64: 2, 16, 32>}, {transform_indices = @transform_6, window_bounds = array<i64: 2, 8, 32>}]} {
    %c0 = arith.constant 0 : index
    %c0_0 = arith.constant 0 : index
    %c0_1 = arith.constant 0 : index
    %0 = vector.load %arg1[%c0, %c0_0, %c0_1] : memref<2x16x32xf32, #tpu.memory_space<vmem>>, vector<2x16x32xf32>
    %c0_2 = arith.constant 0 : index
    %c0_3 = arith.constant 0 : index
    %c0_4 = arith.constant 0 : index
    %1 = vector.load %arg2[%c0_2, %c0_3, %c0_4] : memref<2x8x32xf32, #tpu.memory_space<vmem>>, vector<2x8x32xf32>
    %c0_5 = arith.constant 0 : index
    %c0_6 = arith.constant 0 : index
    %c0_7 = arith.constant 0 : index
    %2 = vector.load %arg3[%c0_5, %c0_6, %c0_7] : memref<4x32x32xf32, #tpu.memory_space<vmem>>, vector<1x32x32xf32>
    %3 = vector.shape_cast %2 : vector<1x32x32xf32> to vector<32x32xf32>
    %c1 = arith.constant 1 : index
    %c0_8 = arith.constant 0 : index
    %c0_9 = arith.constant 0 : index
    %4 = vector.load %arg3[%c1, %c0_8, %c0_9] : memref<4x32x32xf32, #tpu.memory_space<vmem>>, vector<1x32x32xf32>
    %5 = vector.shape_cast %4 : vector<1x32x32xf32> to vector<32x32xf32>
    %c2 = arith.constant 2 : index
    %c0_10 = arith.constant 0 : index
    %c0_11 = arith.constant 0 : index
    %6 = vector.load %arg3[%c2, %c0_10, %c0_11] : memref<4x32x32xf32, #tpu.memory_space<vmem>>, vector<1x32x32xf32>
    %7 = vector.shape_cast %6 : vector<1x32x32xf32> to vector<32x32xf32>
    %c3 = arith.constant 3 : index
    %c0_12 = arith.constant 0 : index
    %c0_13 = arith.constant 0 : index
    %8 = vector.load %arg3[%c3, %c0_12, %c0_13] : memref<4x32x32xf32, #tpu.memory_space<vmem>>, vector<1x32x32xf32>
    %9 = vector.shape_cast %8 : vector<1x32x32xf32> to vector<32x32xf32>
    %c0_14 = arith.constant 0 : index
    %c0_15 = arith.constant 0 : index
    %10 = vector.load %arg5[%c0_14, %c0_15] : memref<16x32xf32, #tpu.memory_space<vmem>>, vector<1x32xf32>
    %c1_16 = arith.constant 1 : index
    %c0_17 = arith.constant 0 : index
    %11 = vector.load %arg5[%c1_16, %c0_17] : memref<16x32xf32, #tpu.memory_space<vmem>>, vector<1x32xf32>
    %c2_18 = arith.constant 2 : index
    %c0_19 = arith.constant 0 : index
    %12 = vector.load %arg5[%c2_18, %c0_19] : memref<16x32xf32, #tpu.memory_space<vmem>>, vector<1x32xf32>
    %c3_20 = arith.constant 3 : index
    %c0_21 = arith.constant 0 : index
    %13 = vector.load %arg5[%c3_20, %c0_21] : memref<16x32xf32, #tpu.memory_space<vmem>>, vector<1x32xf32>
    %c4 = arith.constant 4 : index
    %c0_22 = arith.constant 0 : index
    %14 = vector.load %arg5[%c4, %c0_22] : memref<16x32xf32, #tpu.memory_space<vmem>>, vector<1x32xf32>
    %c5 = arith.constant 5 : index
    %c0_23 = arith.constant 0 : index
    %15 = vector.load %arg5[%c5, %c0_23] : memref<16x32xf32, #tpu.memory_space<vmem>>, vector<1x32xf32>
    %16 = vector.shape_cast %0 : vector<2x16x32xf32> to vector<32x32xf32>
    %17 = vector.shape_cast %1 : vector<2x8x32xf32> to vector<16x32xf32>
    %cst = arith.constant dense<0.000000e+00> : vector<32x32xf32>
    %18 = tpu.matmul %16, %3, %cst {dimension_numbers = #tpu.dot_dimension_numbers<[1], [0], [0], [1], [0, 0, 1, 1], [], []>} : vector<32x32xf32>, vector<32x32xf32>, vector<32x32xf32> -> vector<32x32xf32>
    %19 = vector.broadcast %10 : vector<1x32xf32> to vector<32x32xf32>
    %20 = arith.addf %18, %19 : vector<32x32xf32>
    %cst_24 = arith.constant dense<0.000000e+00> : vector<16x32xf32>
    %21 = tpu.matmul %17, %5, %cst_24 {dimension_numbers = #tpu.dot_dimension_numbers<[1], [0], [0], [1], [0, 0, 1, 1], [], []>} : vector<16x32xf32>, vector<32x32xf32>, vector<16x32xf32> -> vector<16x32xf32>
    %22 = vector.broadcast %11 : vector<1x32xf32> to vector<16x32xf32>
    %23 = arith.addf %21, %22 : vector<16x32xf32>
    %cst_25 = arith.constant dense<0.000000e+00> : vector<16x32xf32>
    %24 = tpu.matmul %17, %7, %cst_25 {dimension_numbers = #tpu.dot_dimension_numbers<[1], [0], [0], [1], [0, 0, 1, 1], [], []>} : vector<16x32xf32>, vector<32x32xf32>, vector<16x32xf32> -> vector<16x32xf32>
    %25 = vector.broadcast %12 : vector<1x32xf32> to vector<16x32xf32>
    %26 = arith.addf %24, %25 : vector<16x32xf32>
    %cst_26 = arith.constant 0.353553385 : f32
    %27 = vector.broadcast %cst_26 : f32 to vector<32x32xf32>
    %28 = arith.mulf %20, %27 : vector<32x32xf32>
    %29 = vector.shape_cast %28 : vector<32x32xf32> to vector<2x16x32xf32>
    %30 = vector.shape_cast %23 : vector<16x32xf32> to vector<2x8x32xf32>
    %31 = tpu.transpose %30, [0, 2, 1] : vector<2x8x32xf32> -> vector<2x32x8xf32>
    %32 = vector.shape_cast %26 : vector<16x32xf32> to vector<2x8x32xf32>
    %cst_27 = arith.constant 0.000000e+00 : f32
    %33 = vector.broadcast %cst_27 : f32 to vector<32x32xf32>
    %34 = vector.extract_strided_slice %29 {offsets = [0, 0, 0], sizes = [2, 16, 8], strides = [1, 1, 1]} : vector<2x16x32xf32> to vector<2x16x8xf32>
    %35 = vector.extract_strided_slice %31 {offsets = [0, 0, 0], sizes = [2, 8, 8], strides = [1, 1, 1]} : vector<2x32x8xf32> to vector<2x8x8xf32>
    "tpu.trace_start"() <{level = 10 : i32, message = "bqd,bdk->bqk"}> : () -> ()
    %cst_28 = arith.constant dense<0.000000e+00> : vector<2x16x8xf32>
    %36 = tpu.matmul %34, %35, %cst_28 {dimension_numbers = #tpu.dot_dimension_numbers<[2], [1], [1], [2], [0, 0, 0, 1, 1, 2], [0], [0]>} : vector<2x16x8xf32>, vector<2x8x8xf32>, vector<2x16x8xf32> -> vector<2x16x8xf32>
    "tpu.trace_stop"() : () -> ()
    %cst_29 = arith.constant dense<0xFF800000> : vector<2x16xf32>
    %37 = vector.multi_reduction <maximumf>, %36, %cst_29 [2] : vector<2x16x8xf32> to vector<2x16xf32>
    %38 = vector.shape_cast %37 : vector<2x16xf32> to vector<2x16x1xf32>
    %39 = vector.broadcast %38 : vector<2x16x1xf32> to vector<2x16x8xf32>
    %40 = arith.subf %36, %39 : vector<2x16x8xf32>
    %41 = math.exp %40 : vector<2x16x8xf32>
    %cst_30 = arith.constant dense<0.000000e+00> : vector<2x16xf32>
    %42 = vector.multi_reduction <add>, %41, %cst_30 [2] : vector<2x16x8xf32> to vector<2x16xf32>
    %43 = vector.shape_cast %42 : vector<2x16xf32> to vector<2x16x1xf32>
    %44 = tpu.reciprocal %43 : vector<2x16x1xf32> -> vector<2x16x1xf32>
    %45 = vector.broadcast %44 : vector<2x16x1xf32> to vector<2x16x8xf32>
    %46 = arith.mulf %41, %45 : vector<2x16x8xf32>
    %47 = vector.extract_strided_slice %32 {offsets = [0, 0, 0], sizes = [2, 8, 8], strides = [1, 1, 1]} : vector<2x8x32xf32> to vector<2x8x8xf32>
    "tpu.trace_start"() <{level = 10 : i32, message = "bqk,bkd->bqd"}> : () -> ()
    %cst_31 = arith.constant dense<0.000000e+00> : vector<2x16x8xf32>
    %48 = tpu.matmul %46, %47, %cst_31 {dimension_numbers = #tpu.dot_dimension_numbers<[2], [1], [1], [2], [0, 0, 0, 1, 1, 2], [0], [0]>} : vector<2x16x8xf32>, vector<2x8x8xf32>, vector<2x16x8xf32> -> vector<2x16x8xf32>
    "tpu.trace_stop"() : () -> ()
    %49 = vector.shape_cast %48 : vector<2x16x8xf32> to vector<32x8xf32>
    %50 = vector.extract_strided_slice %9 {offsets = [0, 0], sizes = [8, 32], strides = [1, 1]} : vector<32x32xf32> to vector<8x32xf32>
    %cst_32 = arith.constant dense<0.000000e+00> : vector<32x32xf32>
    %51 = tpu.matmul %49, %50, %cst_32 {dimension_numbers = #tpu.dot_dimension_numbers<[1], [0], [0], [1], [0, 0, 1, 1], [], []>} : vector<32x8xf32>, vector<8x32xf32>, vector<32x32xf32> -> vector<32x32xf32>
    %52 = arith.addf %33, %51 : vector<32x32xf32>
    %53 = vector.extract_strided_slice %29 {offsets = [0, 0, 8], sizes = [2, 16, 8], strides = [1, 1, 1]} : vector<2x16x32xf32> to vector<2x16x8xf32>
    %54 = vector.extract_strided_slice %31 {offsets = [0, 8, 0], sizes = [2, 8, 8], strides = [1, 1, 1]} : vector<2x32x8xf32> to vector<2x8x8xf32>
    "tpu.trace_start"() <{level = 10 : i32, message = "bqd,bdk->bqk"}> : () -> ()
    %cst_33 = arith.constant dense<0.000000e+00> : vector<2x16x8xf32>
    %55 = tpu.matmul %53, %54, %cst_33 {dimension_numbers = #tpu.dot_dimension_numbers<[2], [1], [1], [2], [0, 0, 0, 1, 1, 2], [0], [0]>} : vector<2x16x8xf32>, vector<2x8x8xf32>, vector<2x16x8xf32> -> vector<2x16x8xf32>
    "tpu.trace_stop"() : () -> ()
    %cst_34 = arith.constant dense<0xFF800000> : vector<2x16xf32>
    %56 = vector.multi_reduction <maximumf>, %55, %cst_34 [2] : vector<2x16x8xf32> to vector<2x16xf32>
    %57 = vector.shape_cast %56 : vector<2x16xf32> to vector<2x16x1xf32>
    %58 = vector.broadcast %57 : vector<2x16x1xf32> to vector<2x16x8xf32>
    %59 = arith.subf %55, %58 : vector<2x16x8xf32>
    %60 = math.exp %59 : vector<2x16x8xf32>
    %cst_35 = arith.constant dense<0.000000e+00> : vector<2x16xf32>
    %61 = vector.multi_reduction <add>, %60, %cst_35 [2] : vector<2x16x8xf32> to vector<2x16xf32>
    %62 = vector.shape_cast %61 : vector<2x16xf32> to vector<2x16x1xf32>
    %63 = tpu.reciprocal %62 : vector<2x16x1xf32> -> vector<2x16x1xf32>
    %64 = vector.broadcast %63 : vector<2x16x1xf32> to vector<2x16x8xf32>
    %65 = arith.mulf %60, %64 : vector<2x16x8xf32>
    %66 = vector.extract_strided_slice %32 {offsets = [0, 0, 8], sizes = [2, 8, 8], strides = [1, 1, 1]} : vector<2x8x32xf32> to vector<2x8x8xf32>
    "tpu.trace_start"() <{level = 10 : i32, message = "bqk,bkd->bqd"}> : () -> ()
    %cst_36 = arith.constant dense<0.000000e+00> : vector<2x16x8xf32>
    %67 = tpu.matmul %65, %66, %cst_36 {dimension_numbers = #tpu.dot_dimension_numbers<[2], [1], [1], [2], [0, 0, 0, 1, 1, 2], [0], [0]>} : vector<2x16x8xf32>, vector<2x8x8xf32>, vector<2x16x8xf32> -> vector<2x16x8xf32>
    "tpu.trace_stop"() : () -> ()
    %68 = vector.shape_cast %67 : vector<2x16x8xf32> to vector<32x8xf32>
    %69 = vector.extract_strided_slice %9 {offsets = [8, 0], sizes = [8, 32], strides = [1, 1]} : vector<32x32xf32> to vector<8x32xf32>
    %cst_37 = arith.constant dense<0.000000e+00> : vector<32x32xf32>
    %70 = tpu.matmul %68, %69, %cst_37 {dimension_numbers = #tpu.dot_dimension_numbers<[1], [0], [0], [1], [0, 0, 1, 1], [], []>} : vector<32x8xf32>, vector<8x32xf32>, vector<32x32xf32> -> vector<32x32xf32>
    %71 = arith.addf %52, %70 : vector<32x32xf32>
    %72 = vector.extract_strided_slice %29 {offsets = [0, 0, 16], sizes = [2, 16, 8], strides = [1, 1, 1]} : vector<2x16x32xf32> to vector<2x16x8xf32>
    %73 = vector.extract_strided_slice %31 {offsets = [0, 16, 0], sizes = [2, 8, 8], strides = [1, 1, 1]} : vector<2x32x8xf32> to vector<2x8x8xf32>
    "tpu.trace_start"() <{level = 10 : i32, message = "bqd,bdk->bqk"}> : () -> ()
    %cst_38 = arith.constant dense<0.000000e+00> : vector<2x16x8xf32>
    %74 = tpu.matmul %72, %73, %cst_38 {dimension_numbers = #tpu.dot_dimension_numbers<[2], [1], [1], [2], [0, 0, 0, 1, 1, 2], [0], [0]>} : vector<2x16x8xf32>, vector<2x8x8xf32>, vector<2x16x8xf32> -> vector<2x16x8xf32>
    "tpu.trace_stop"() : () -> ()
    %cst_39 = arith.constant dense<0xFF800000> : vector<2x16xf32>
    %75 = vector.multi_reduction <maximumf>, %74, %cst_39 [2] : vector<2x16x8xf32> to vector<2x16xf32>
    %76 = vector.shape_cast %75 : vector<2x16xf32> to vector<2x16x1xf32>
    %77 = vector.broadcast %76 : vector<2x16x1xf32> to vector<2x16x8xf32>
    %78 = arith.subf %74, %77 : vector<2x16x8xf32>
    %79 = math.exp %78 : vector<2x16x8xf32>
    %cst_40 = arith.constant dense<0.000000e+00> : vector<2x16xf32>
    %80 = vector.multi_reduction <add>, %79, %cst_40 [2] : vector<2x16x8xf32> to vector<2x16xf32>
    %81 = vector.shape_cast %80 : vector<2x16xf32> to vector<2x16x1xf32>
    %82 = tpu.reciprocal %81 : vector<2x16x1xf32> -> vector<2x16x1xf32>
    %83 = vector.broadcast %82 : vector<2x16x1xf32> to vector<2x16x8xf32>
    %84 = arith.mulf %79, %83 : vector<2x16x8xf32>
    %85 = vector.extract_strided_slice %32 {offsets = [0, 0, 16], sizes = [2, 8, 8], strides = [1, 1, 1]} : vector<2x8x32xf32> to vector<2x8x8xf32>
    "tpu.trace_start"() <{level = 10 : i32, message = "bqk,bkd->bqd"}> : () -> ()
    %cst_41 = arith.constant dense<0.000000e+00> : vector<2x16x8xf32>
    %86 = tpu.matmul %84, %85, %cst_41 {dimension_numbers = #tpu.dot_dimension_numbers<[2], [1], [1], [2], [0, 0, 0, 1, 1, 2], [0], [0]>} : vector<2x16x8xf32>, vector<2x8x8xf32>, vector<2x16x8xf32> -> vector<2x16x8xf32>
    "tpu.trace_stop"() : () -> ()
    %87 = vector.shape_cast %86 : vector<2x16x8xf32> to vector<32x8xf32>
    %88 = vector.extract_strided_slice %9 {offsets = [16, 0], sizes = [8, 32], strides = [1, 1]} : vector<32x32xf32> to vector<8x32xf32>
    %cst_42 = arith.constant dense<0.000000e+00> : vector<32x32xf32>
    %89 = tpu.matmul %87, %88, %cst_42 {dimension_numbers = #tpu.dot_dimension_numbers<[1], [0], [0], [1], [0, 0, 1, 1], [], []>} : vector<32x8xf32>, vector<8x32xf32>, vector<32x32xf32> -> vector<32x32xf32>
    %90 = arith.addf %71, %89 : vector<32x32xf32>
    %91 = vector.extract_strided_slice %29 {offsets = [0, 0, 24], sizes = [2, 16, 8], strides = [1, 1, 1]} : vector<2x16x32xf32> to vector<2x16x8xf32>
    %92 = vector.extract_strided_slice %31 {offsets = [0, 24, 0], sizes = [2, 8, 8], strides = [1, 1, 1]} : vector<2x32x8xf32> to vector<2x8x8xf32>
    "tpu.trace_start"() <{level = 10 : i32, message = "bqd,bdk->bqk"}> : () -> ()
    %cst_43 = arith.constant dense<0.000000e+00> : vector<2x16x8xf32>
    %93 = tpu.matmul %91, %92, %cst_43 {dimension_numbers = #tpu.dot_dimension_numbers<[2], [1], [1], [2], [0, 0, 0, 1, 1, 2], [0], [0]>} : vector<2x16x8xf32>, vector<2x8x8xf32>, vector<2x16x8xf32> -> vector<2x16x8xf32>
    "tpu.trace_stop"() : () -> ()
    %cst_44 = arith.constant dense<0xFF800000> : vector<2x16xf32>
    %94 = vector.multi_reduction <maximumf>, %93, %cst_44 [2] : vector<2x16x8xf32> to vector<2x16xf32>
    %95 = vector.shape_cast %94 : vector<2x16xf32> to vector<2x16x1xf32>
    %96 = vector.broadcast %95 : vector<2x16x1xf32> to vector<2x16x8xf32>
    %97 = arith.subf %93, %96 : vector<2x16x8xf32>
    %98 = math.exp %97 : vector<2x16x8xf32>
    %cst_45 = arith.constant dense<0.000000e+00> : vector<2x16xf32>
    %99 = vector.multi_reduction <add>, %98, %cst_45 [2] : vector<2x16x8xf32> to vector<2x16xf32>
    %100 = vector.shape_cast %99 : vector<2x16xf32> to vector<2x16x1xf32>
    %101 = tpu.reciprocal %100 : vector<2x16x1xf32> -> vector<2x16x1xf32>
    %102 = vector.broadcast %101 : vector<2x16x1xf32> to vector<2x16x8xf32>
    %103 = arith.mulf %98, %102 : vector<2x16x8xf32>
    %104 = vector.extract_strided_slice %32 {offsets = [0, 0, 24], sizes = [2, 8, 8], strides = [1, 1, 1]} : vector<2x8x32xf32> to vector<2x8x8xf32>
    "tpu.trace_start"() <{level = 10 : i32, message = "bqk,bkd->bqd"}> : () -> ()
    %cst_46 = arith.constant dense<0.000000e+00> : vector<2x16x8xf32>
    %105 = tpu.matmul %103, %104, %cst_46 {dimension_numbers = #tpu.dot_dimension_numbers<[2], [1], [1], [2], [0, 0, 0, 1, 1, 2], [0], [0]>} : vector<2x16x8xf32>, vector<2x8x8xf32>, vector<2x16x8xf32> -> vector<2x16x8xf32>
    "tpu.trace_stop"() : () -> ()
    %106 = vector.shape_cast %105 : vector<2x16x8xf32> to vector<32x8xf32>
    %107 = vector.extract_strided_slice %9 {offsets = [24, 0], sizes = [8, 32], strides = [1, 1]} : vector<32x32xf32> to vector<8x32xf32>
    %cst_47 = arith.constant dense<0.000000e+00> : vector<32x32xf32>
    %108 = tpu.matmul %106, %107, %cst_47 {dimension_numbers = #tpu.dot_dimension_numbers<[1], [0], [0], [1], [0, 0, 1, 1], [], []>} : vector<32x8xf32>, vector<8x32xf32>, vector<32x32xf32> -> vector<32x32xf32>
    %109 = arith.addf %90, %108 : vector<32x32xf32>
    %110 = vector.broadcast %13 : vector<1x32xf32> to vector<32x32xf32>
    %111 = arith.addf %109, %110 : vector<32x32xf32>
    %112 = vector.shape_cast %0 : vector<2x16x32xf32> to vector<32x32xf32>
    %113 = arith.addf %112, %111 : vector<32x32xf32>
    %cst_48 = arith.constant dense<0.000000e+00> : vector<32xf32>
    %114 = vector.multi_reduction <add>, %113, %cst_48 [1] : vector<32x32xf32> to vector<32xf32>
    %115 = vector.shape_cast %114 : vector<32xf32> to vector<32x1xf32>
    %cst_49 = arith.constant 3.200000e+01 : f32
    %116 = vector.broadcast %cst_49 : f32 to vector<32x1xf32>
    %117 = arith.divf %115, %116 : vector<32x1xf32>
    %118 = vector.broadcast %117 : vector<32x1xf32> to vector<32x32xf32>
    %119 = arith.subf %113, %118 : vector<32x32xf32>
    %120 = arith.mulf %119, %119 : vector<32x32xf32>
    %cst_50 = arith.constant dense<0.000000e+00> : vector<32xf32>
    %121 = vector.multi_reduction <add>, %120, %cst_50 [1] : vector<32x32xf32> to vector<32xf32>
    %122 = vector.shape_cast %121 : vector<32xf32> to vector<32x1xf32>
    %cst_51 = arith.constant 3.200000e+01 : f32
    %123 = vector.broadcast %cst_51 : f32 to vector<32x1xf32>
    %124 = arith.divf %122, %123 : vector<32x1xf32>
    %125 = vector.broadcast %117 : vector<32x1xf32> to vector<32x32xf32>
    %126 = arith.subf %113, %125 : vector<32x32xf32>
    %cst_52 = arith.constant 9.99999974E-6 : f32
    %127 = vector.broadcast %cst_52 : f32 to vector<32x1xf32>
    %128 = arith.addf %124, %127 : vector<32x1xf32>
    %129 = math.rsqrt %128 : vector<32x1xf32>
    %130 = vector.broadcast %129 : vector<32x1xf32> to vector<32x32xf32>
    %131 = arith.mulf %126, %130 : vector<32x32xf32>
    %132 = vector.broadcast %14 : vector<1x32xf32> to vector<32x32xf32>
    %133 = arith.mulf %131, %132 : vector<32x32xf32>
    %134 = vector.broadcast %15 : vector<1x32xf32> to vector<32x32xf32>
    %135 = arith.addf %133, %134 : vector<32x32xf32>
    %136 = vector.shape_cast %135 : vector<32x32xf32> to vector<2x16x32xf32>
    %c0_53 = arith.constant 0 : index
    %c0_54 = arith.constant 0 : index
    %c0_55 = arith.constant 0 : index
    %137 = vector.load %arg6[%c0_53, %c0_54, %c0_55] : memref<2x16x32xf32, #tpu.memory_space<vmem>>, vector<2x16x32xf32>
    tpu.vector_store %arg6[%c0_53, %c0_54, %c0_55], %136 {strides = array<i32>} : memref<2x16x32xf32, #tpu.memory_space<vmem>>, vector<2x16x32xf32>,
    %c0_56 = arith.constant 0 : index
    %c0_57 = arith.constant 0 : index
    %c0_58 = arith.constant 0 : index
    %138 = vector.load %arg4[%c0_56, %c0_57, %c0_58] : memref<4x32x32xf32, #tpu.memory_space<vmem>>, vector<1x32x32xf32>
    %139 = vector.shape_cast %138 : vector<1x32x32xf32> to vector<32x32xf32>
    %c1_59 = arith.constant 1 : index
    %c0_60 = arith.constant 0 : index
    %c0_61 = arith.constant 0 : index
    %140 = vector.load %arg4[%c1_59, %c0_60, %c0_61] : memref<4x32x32xf32, #tpu.memory_space<vmem>>, vector<1x32x32xf32>
    %141 = vector.shape_cast %140 : vector<1x32x32xf32> to vector<32x32xf32>
    %c2_62 = arith.constant 2 : index
    %c0_63 = arith.constant 0 : index
    %c0_64 = arith.constant 0 : index
    %142 = vector.load %arg4[%c2_62, %c0_63, %c0_64] : memref<4x32x32xf32, #tpu.memory_space<vmem>>, vector<1x32x32xf32>
    %143 = vector.shape_cast %142 : vector<1x32x32xf32> to vector<32x32xf32>
    %c3_65 = arith.constant 3 : index
    %c0_66 = arith.constant 0 : index
    %c0_67 = arith.constant 0 : index
    %144 = vector.load %arg4[%c3_65, %c0_66, %c0_67] : memref<4x32x32xf32, #tpu.memory_space<vmem>>, vector<1x32x32xf32>
    %145 = vector.shape_cast %144 : vector<1x32x32xf32> to vector<32x32xf32>
    %c8 = arith.constant 8 : index
    %c0_68 = arith.constant 0 : index
    %146 = vector.load %arg5[%c8, %c0_68] : memref<16x32xf32, #tpu.memory_space<vmem>>, vector<1x32xf32>
    %c9 = arith.constant 9 : index
    %c0_69 = arith.constant 0 : index
    %147 = vector.load %arg5[%c9, %c0_69] : memref<16x32xf32, #tpu.memory_space<vmem>>, vector<1x32xf32>
    %c10 = arith.constant 10 : index
    %c0_70 = arith.constant 0 : index
    %148 = vector.load %arg5[%c10, %c0_70] : memref<16x32xf32, #tpu.memory_space<vmem>>, vector<1x32xf32>
    %c11 = arith.constant 11 : index
    %c0_71 = arith.constant 0 : index
    %149 = vector.load %arg5[%c11, %c0_71] : memref<16x32xf32, #tpu.memory_space<vmem>>, vector<1x32xf32>
    %c12 = arith.constant 12 : index
    %c0_72 = arith.constant 0 : index
    %150 = vector.load %arg5[%c12, %c0_72] : memref<16x32xf32, #tpu.memory_space<vmem>>, vector<1x32xf32>
    %c13 = arith.constant 13 : index
    %c0_73 = arith.constant 0 : index
    %151 = vector.load %arg5[%c13, %c0_73] : memref<16x32xf32, #tpu.memory_space<vmem>>, vector<1x32xf32>
    %152 = vector.shape_cast %1 : vector<2x8x32xf32> to vector<16x32xf32>
    %153 = vector.shape_cast %0 : vector<2x16x32xf32> to vector<32x32xf32>
    %cst_74 = arith.constant dense<0.000000e+00> : vector<16x32xf32>
    %154 = tpu.matmul %152, %139, %cst_74 {dimension_numbers = #tpu.dot_dimension_numbers<[1], [0], [0], [1], [0, 0, 1, 1], [], []>} : vector<16x32xf32>, vector<32x32xf32>, vector<16x32xf32> -> vector<16x32xf32>
    %155 = vector.broadcast %146 : vector<1x32xf32> to vector<16x32xf32>
    %156 = arith.addf %154, %155 : vector<16x32xf32>
    %cst_75 = arith.constant dense<0.000000e+00> : vector<32x32xf32>
    %157 = tpu.matmul %153, %141, %cst_75 {dimension_numbers = #tpu.dot_dimension_numbers<[1], [0], [0], [1], [0, 0, 1, 1], [], []>} : vector<32x32xf32>, vector<32x32xf32>, vector<32x32xf32> -> vector<32x32xf32>
    %158 = vector.broadcast %147 : vector<1x32xf32> to vector<32x32xf32>
    %159 = arith.addf %157, %158 : vector<32x32xf32>
    %cst_76 = arith.constant dense<0.000000e+00> : vector<32x32xf32>
    %160 = tpu.matmul %153, %143, %cst_76 {dimension_numbers = #tpu.dot_dimension_numbers<[1], [0], [0], [1], [0, 0, 1, 1], [], []>} : vector<32x32xf32>, vector<32x32xf32>, vector<32x32xf32> -> vector<32x32xf32>
    %161 = vector.broadcast %148 : vector<1x32xf32> to vector<32x32xf32>
    %162 = arith.addf %160, %161 : vector<32x32xf32>
    %cst_77 = arith.constant 0.353553385 : f32
    %163 = vector.broadcast %cst_77 : f32 to vector<16x32xf32>
    %164 = arith.mulf %156, %163 : vector<16x32xf32>
    %165 = vector.shape_cast %164 : vector<16x32xf32> to vector<2x8x32xf32>
    %166 = vector.shape_cast %159 : vector<32x32xf32> to vector<2x16x32xf32>
    %167 = tpu.transpose %166, [0, 2, 1] : vector<2x16x32xf32> -> vector<2x32x16xf32>
    %168 = vector.shape_cast %162 : vector<32x32xf32> to vector<2x16x32xf32>
    %cst_78 = arith.constant 0.000000e+00 : f32
    %169 = vector.broadcast %cst_78 : f32 to vector<16x32xf32>
    %170 = vector.extract_strided_slice %165 {offsets = [0, 0, 0], sizes = [2, 8, 8], strides = [1, 1, 1]} : vector<2x8x32xf32> to vector<2x8x8xf32>
    %171 = vector.extract_strided_slice %167 {offsets = [0, 0, 0], sizes = [2, 8, 16], strides = [1, 1, 1]} : vector<2x32x16xf32> to vector<2x8x16xf32>
    "tpu.trace_start"() <{level = 10 : i32, message = "bqd,bdk->bqk"}> : () -> ()
    %cst_79 = arith.constant dense<0.000000e+00> : vector<2x8x16xf32>
    %172 = tpu.matmul %170, %171, %cst_79 {dimension_numbers = #tpu.dot_dimension_numbers<[2], [1], [1], [2], [0, 0, 0, 1, 1, 2], [0], [0]>} : vector<2x8x8xf32>, vector<2x8x16xf32>, vector<2x8x16xf32> -> vector<2x8x16xf32>
    "tpu.trace_stop"() : () -> ()
    %cst_80 = arith.constant dense<0xFF800000> : vector<2x8xf32>
    %173 = vector.multi_reduction <maximumf>, %172, %cst_80 [2] : vector<2x8x16xf32> to vector<2x8xf32>
    %174 = vector.shape_cast %173 : vector<2x8xf32> to vector<2x8x1xf32>
    %175 = vector.broadcast %174 : vector<2x8x1xf32> to vector<2x8x16xf32>
    %176 = arith.subf %172, %175 : vector<2x8x16xf32>
    %177 = math.exp %176 : vector<2x8x16xf32>
    %cst_81 = arith.constant dense<0.000000e+00> : vector<2x8xf32>
    %178 = vector.multi_reduction <add>, %177, %cst_81 [2] : vector<2x8x16xf32> to vector<2x8xf32>
    %179 = vector.shape_cast %178 : vector<2x8xf32> to vector<2x8x1xf32>
    %180 = tpu.reciprocal %179 : vector<2x8x1xf32> -> vector<2x8x1xf32>
    %181 = vector.broadcast %180 : vector<2x8x1xf32> to vector<2x8x16xf32>
    %182 = arith.mulf %177, %181 : vector<2x8x16xf32>
    %183 = vector.extract_strided_slice %168 {offsets = [0, 0, 0], sizes = [2, 16, 8], strides = [1, 1, 1]} : vector<2x16x32xf32> to vector<2x16x8xf32>
    "tpu.trace_start"() <{level = 10 : i32, message = "bqk,bkd->bqd"}> : () -> ()
    %cst_82 = arith.constant dense<0.000000e+00> : vector<2x8x8xf32>
    %184 = tpu.matmul %182, %183, %cst_82 {dimension_numbers = #tpu.dot_dimension_numbers<[2], [1], [1], [2], [0, 0, 0, 1, 1, 2], [0], [0]>} : vector<2x8x16xf32>, vector<2x16x8xf32>, vector<2x8x8xf32> -> vector<2x8x8xf32>
    "tpu.trace_stop"() : () -> ()
    %185 = vector.shape_cast %184 : vector<2x8x8xf32> to vector<16x8xf32>
    %186 = vector.extract_strided_slice %145 {offsets = [0, 0], sizes = [8, 32], strides = [1, 1]} : vector<32x32xf32> to vector<8x32xf32>
    %cst_83 = arith.constant dense<0.000000e+00> : vector<16x32xf32>
    %187 = tpu.matmul %185, %186, %cst_83 {dimension_numbers = #tpu.dot_dimension_numbers<[1], [0], [0], [1], [0, 0, 1, 1], [], []>} : vector<16x8xf32>, vector<8x32xf32>, vector<16x32xf32> -> vector<16x32xf32>
    %188 = arith.addf %169, %187 : vector<16x32xf32>
    %189 = vector.extract_strided_slice %165 {offsets = [0, 0, 8], sizes = [2, 8, 8], strides = [1, 1, 1]} : vector<2x8x32xf32> to vector<2x8x8xf32>
    %190 = vector.extract_strided_slice %167 {offsets = [0, 8, 0], sizes = [2, 8, 16], strides = [1, 1, 1]} : vector<2x32x16xf32> to vector<2x8x16xf32>
    "tpu.trace_start"() <{level = 10 : i32, message = "bqd,bdk->bqk"}> : () -> ()
    %cst_84 = arith.constant dense<0.000000e+00> : vector<2x8x16xf32>
    %191 = tpu.matmul %189, %190, %cst_84 {dimension_numbers = #tpu.dot_dimension_numbers<[2], [1], [1], [2], [0, 0, 0, 1, 1, 2], [0], [0]>} : vector<2x8x8xf32>, vector<2x8x16xf32>, vector<2x8x16xf32> -> vector<2x8x16xf32>
    "tpu.trace_stop"() : () -> ()
    %cst_85 = arith.constant dense<0xFF800000> : vector<2x8xf32>
    %192 = vector.multi_reduction <maximumf>, %191, %cst_85 [2] : vector<2x8x16xf32> to vector<2x8xf32>
    %193 = vector.shape_cast %192 : vector<2x8xf32> to vector<2x8x1xf32>
    %194 = vector.broadcast %193 : vector<2x8x1xf32> to vector<2x8x16xf32>
    %195 = arith.subf %191, %194 : vector<2x8x16xf32>
    %196 = math.exp %195 : vector<2x8x16xf32>
    %cst_86 = arith.constant dense<0.000000e+00> : vector<2x8xf32>
    %197 = vector.multi_reduction <add>, %196, %cst_86 [2] : vector<2x8x16xf32> to vector<2x8xf32>
    %198 = vector.shape_cast %197 : vector<2x8xf32> to vector<2x8x1xf32>
    %199 = tpu.reciprocal %198 : vector<2x8x1xf32> -> vector<2x8x1xf32>
    %200 = vector.broadcast %199 : vector<2x8x1xf32> to vector<2x8x16xf32>
    %201 = arith.mulf %196, %200 : vector<2x8x16xf32>
    %202 = vector.extract_strided_slice %168 {offsets = [0, 0, 8], sizes = [2, 16, 8], strides = [1, 1, 1]} : vector<2x16x32xf32> to vector<2x16x8xf32>
    "tpu.trace_start"() <{level = 10 : i32, message = "bqk,bkd->bqd"}> : () -> ()
    %cst_87 = arith.constant dense<0.000000e+00> : vector<2x8x8xf32>
    %203 = tpu.matmul %201, %202, %cst_87 {dimension_numbers = #tpu.dot_dimension_numbers<[2], [1], [1], [2], [0, 0, 0, 1, 1, 2], [0], [0]>} : vector<2x8x16xf32>, vector<2x16x8xf32>, vector<2x8x8xf32> -> vector<2x8x8xf32>
    "tpu.trace_stop"() : () -> ()
    %204 = vector.shape_cast %203 : vector<2x8x8xf32> to vector<16x8xf32>
    %205 = vector.extract_strided_slice %145 {offsets = [8, 0], sizes = [8, 32], strides = [1, 1]} : vector<32x32xf32> to vector<8x32xf32>
    %cst_88 = arith.constant dense<0.000000e+00> : vector<16x32xf32>
    %206 = tpu.matmul %204, %205, %cst_88 {dimension_numbers = #tpu.dot_dimension_numbers<[1], [0], [0], [1], [0, 0, 1, 1], [], []>} : vector<16x8xf32>, vector<8x32xf32>, vector<16x32xf32> -> vector<16x32xf32>
    %207 = arith.addf %188, %206 : vector<16x32xf32>
    %208 = vector.extract_strided_slice %165 {offsets = [0, 0, 16], sizes = [2, 8, 8], strides = [1, 1, 1]} : vector<2x8x32xf32> to vector<2x8x8xf32>
    %209 = vector.extract_strided_slice %167 {offsets = [0, 16, 0], sizes = [2, 8, 16], strides = [1, 1, 1]} : vector<2x32x16xf32> to vector<2x8x16xf32>
    "tpu.trace_start"() <{level = 10 : i32, message = "bqd,bdk->bqk"}> : () -> ()
    %cst_89 = arith.constant dense<0.000000e+00> : vector<2x8x16xf32>
    %210 = tpu.matmul %208, %209, %cst_89 {dimension_numbers = #tpu.dot_dimension_numbers<[2], [1], [1], [2], [0, 0, 0, 1, 1, 2], [0], [0]>} : vector<2x8x8xf32>, vector<2x8x16xf32>, vector<2x8x16xf32> -> vector<2x8x16xf32>
    "tpu.trace_stop"() : () -> ()
    %cst_90 = arith.constant dense<0xFF800000> : vector<2x8xf32>
    %211 = vector.multi_reduction <maximumf>, %210, %cst_90 [2] : vector<2x8x16xf32> to vector<2x8xf32>
    %212 = vector.shape_cast %211 : vector<2x8xf32> to vector<2x8x1xf32>
    %213 = vector.broadcast %212 : vector<2x8x1xf32> to vector<2x8x16xf32>
    %214 = arith.subf %210, %213 : vector<2x8x16xf32>
    %215 = math.exp %214 : vector<2x8x16xf32>
    %cst_91 = arith.constant dense<0.000000e+00> : vector<2x8xf32>
    %216 = vector.multi_reduction <add>, %215, %cst_91 [2] : vector<2x8x16xf32> to vector<2x8xf32>
    %217 = vector.shape_cast %216 : vector<2x8xf32> to vector<2x8x1xf32>
    %218 = tpu.reciprocal %217 : vector<2x8x1xf32> -> vector<2x8x1xf32>
    %219 = vector.broadcast %218 : vector<2x8x1xf32> to vector<2x8x16xf32>
    %220 = arith.mulf %215, %219 : vector<2x8x16xf32>
    %221 = vector.extract_strided_slice %168 {offsets = [0, 0, 16], sizes = [2, 16, 8], strides = [1, 1, 1]} : vector<2x16x32xf32> to vector<2x16x8xf32>
    "tpu.trace_start"() <{level = 10 : i32, message = "bqk,bkd->bqd"}> : () -> ()
    %cst_92 = arith.constant dense<0.000000e+00> : vector<2x8x8xf32>
    %222 = tpu.matmul %220, %221, %cst_92 {dimension_numbers = #tpu.dot_dimension_numbers<[2], [1], [1], [2], [0, 0, 0, 1, 1, 2], [0], [0]>} : vector<2x8x16xf32>, vector<2x16x8xf32>, vector<2x8x8xf32> -> vector<2x8x8xf32>
    "tpu.trace_stop"() : () -> ()
    %223 = vector.shape_cast %222 : vector<2x8x8xf32> to vector<16x8xf32>
    %224 = vector.extract_strided_slice %145 {offsets = [16, 0], sizes = [8, 32], strides = [1, 1]} : vector<32x32xf32> to vector<8x32xf32>
    %cst_93 = arith.constant dense<0.000000e+00> : vector<16x32xf32>
    %225 = tpu.matmul %223, %224, %cst_93 {dimension_numbers = #tpu.dot_dimension_numbers<[1], [0], [0], [1], [0, 0, 1, 1], [], []>} : vector<16x8xf32>, vector<8x32xf32>, vector<16x32xf32> -> vector<16x32xf32>
    %226 = arith.addf %207, %225 : vector<16x32xf32>
    %227 = vector.extract_strided_slice %165 {offsets = [0, 0, 24], sizes = [2, 8, 8], strides = [1, 1, 1]} : vector<2x8x32xf32> to vector<2x8x8xf32>
    %228 = vector.extract_strided_slice %167 {offsets = [0, 24, 0], sizes = [2, 8, 16], strides = [1, 1, 1]} : vector<2x32x16xf32> to vector<2x8x16xf32>
    "tpu.trace_start"() <{level = 10 : i32, message = "bqd,bdk->bqk"}> : () -> ()
    %cst_94 = arith.constant dense<0.000000e+00> : vector<2x8x16xf32>
    %229 = tpu.matmul %227, %228, %cst_94 {dimension_numbers = #tpu.dot_dimension_numbers<[2], [1], [1], [2], [0, 0, 0, 1, 1, 2], [0], [0]>} : vector<2x8x8xf32>, vector<2x8x16xf32>, vector<2x8x16xf32> -> vector<2x8x16xf32>
    "tpu.trace_stop"() : () -> ()
    %cst_95 = arith.constant dense<0xFF800000> : vector<2x8xf32>
    %230 = vector.multi_reduction <maximumf>, %229, %cst_95 [2] : vector<2x8x16xf32> to vector<2x8xf32>
    %231 = vector.shape_cast %230 : vector<2x8xf32> to vector<2x8x1xf32>
    %232 = vector.broadcast %231 : vector<2x8x1xf32> to vector<2x8x16xf32>
    %233 = arith.subf %229, %232 : vector<2x8x16xf32>
    %234 = math.exp %233 : vector<2x8x16xf32>
    %cst_96 = arith.constant dense<0.000000e+00> : vector<2x8xf32>
    %235 = vector.multi_reduction <add>, %234, %cst_96 [2] : vector<2x8x16xf32> to vector<2x8xf32>
    %236 = vector.shape_cast %235 : vector<2x8xf32> to vector<2x8x1xf32>
    %237 = tpu.reciprocal %236 : vector<2x8x1xf32> -> vector<2x8x1xf32>
    %238 = vector.broadcast %237 : vector<2x8x1xf32> to vector<2x8x16xf32>
    %239 = arith.mulf %234, %238 : vector<2x8x16xf32>
    %240 = vector.extract_strided_slice %168 {offsets = [0, 0, 24], sizes = [2, 16, 8], strides = [1, 1, 1]} : vector<2x16x32xf32> to vector<2x16x8xf32>
    "tpu.trace_start"() <{level = 10 : i32, message = "bqk,bkd->bqd"}> : () -> ()
    %cst_97 = arith.constant dense<0.000000e+00> : vector<2x8x8xf32>
    %241 = tpu.matmul %239, %240, %cst_97 {dimension_numbers = #tpu.dot_dimension_numbers<[2], [1], [1], [2], [0, 0, 0, 1, 1, 2], [0], [0]>} : vector<2x8x16xf32>, vector<2x16x8xf32>, vector<2x8x8xf32> -> vector<2x8x8xf32>
    "tpu.trace_stop"() : () -> ()
    %242 = vector.shape_cast %241 : vector<2x8x8xf32> to vector<16x8xf32>
    %243 = vector.extract_strided_slice %145 {offsets = [24, 0], sizes = [8, 32], strides = [1, 1]} : vector<32x32xf32> to vector<8x32xf32>
    %cst_98 = arith.constant dense<0.000000e+00> : vector<16x32xf32>
    %244 = tpu.matmul %242, %243, %cst_98 {dimension_numbers = #tpu.dot_dimension_numbers<[1], [0], [0], [1], [0, 0, 1, 1], [], []>} : vector<16x8xf32>, vector<8x32xf32>, vector<16x32xf32> -> vector<16x32xf32>
    %245 = arith.addf %226, %244 : vector<16x32xf32>
    %246 = vector.broadcast %149 : vector<1x32xf32> to vector<16x32xf32>
    %247 = arith.addf %245, %246 : vector<16x32xf32>
    %248 = vector.shape_cast %1 : vector<2x8x32xf32> to vector<16x32xf32>
    %249 = arith.addf %248, %247 : vector<16x32xf32>
    %cst_99 = arith.constant dense<0.000000e+00> : vector<16xf32>
    %250 = vector.multi_reduction <add>, %249, %cst_99 [1] : vector<16x32xf32> to vector<16xf32>
    %251 = vector.shape_cast %250 : vector<16xf32> to vector<16x1xf32>
    %cst_100 = arith.constant 3.200000e+01 : f32
    %252 = vector.broadcast %cst_100 : f32 to vector<16x1xf32>
    %253 = arith.divf %251, %252 : vector<16x1xf32>
    %254 = vector.broadcast %253 : vector<16x1xf32> to vector<16x32xf32>
    %255 = arith.subf %249, %254 : vector<16x32xf32>
    %256 = arith.mulf %255, %255 : vector<16x32xf32>
    %cst_101 = arith.constant dense<0.000000e+00> : vector<16xf32>
    %257 = vector.multi_reduction <add>, %256, %cst_101 [1] : vector<16x32xf32> to vector<16xf32>
    %258 = vector.shape_cast %257 : vector<16xf32> to vector<16x1xf32>
    %cst_102 = arith.constant 3.200000e+01 : f32
    %259 = vector.broadcast %cst_102 : f32 to vector<16x1xf32>
    %260 = arith.divf %258, %259 : vector<16x1xf32>
    %261 = vector.broadcast %253 : vector<16x1xf32> to vector<16x32xf32>
    %262 = arith.subf %249, %261 : vector<16x32xf32>
    %cst_103 = arith.constant 9.99999974E-6 : f32
    %263 = vector.broadcast %cst_103 : f32 to vector<16x1xf32>
    %264 = arith.addf %260, %263 : vector<16x1xf32>
    %265 = math.rsqrt %264 : vector<16x1xf32>
    %266 = vector.broadcast %265 : vector<16x1xf32> to vector<16x32xf32>
    %267 = arith.mulf %262, %266 : vector<16x32xf32>
    %268 = vector.broadcast %150 : vector<1x32xf32> to vector<16x32xf32>
    %269 = arith.mulf %267, %268 : vector<16x32xf32>
    %270 = vector.broadcast %151 : vector<1x32xf32> to vector<16x32xf32>
    %271 = arith.addf %269, %270 : vector<16x32xf32>
    %272 = vector.shape_cast %271 : vector<16x32xf32> to vector<2x8x32xf32>
    %c0_104 = arith.constant 0 : index
    %c0_105 = arith.constant 0 : index
    %c0_106 = arith.constant 0 : index
    %273 = vector.load %arg7[%c0_104, %c0_105, %c0_106] : memref<2x8x32xf32, #tpu.memory_space<vmem>>, vector<2x8x32xf32>
    tpu.vector_store %arg7[%c0_104, %c0_105, %c0_106], %272 {strides = array<i32>} : memref<2x8x32xf32, #tpu.memory_space<vmem>>, vector<2x8x32xf32>,
    return
  }
  func.func @transform_0(%arg0: i32) -> (i32, i32, i32) {
    %c0_i32 = arith.constant 0 : i32
    %c0_i32_0 = arith.constant 0 : i32
    %c0_i32_1 = arith.constant 0 : i32
    return %arg0, %c0_i32, %c0_i32_0 : i32, i32, i32
  }
  func.func @transform_1(%arg0: i32) -> (i32, i32, i32) {
    %c0_i32 = arith.constant 0 : i32
    %c0_i32_0 = arith.constant 0 : i32
    %c0_i32_1 = arith.constant 0 : i32
    return %arg0, %c0_i32, %c0_i32_0 : i32, i32, i32
  }
  func.func @transform_2(%arg0: i32) -> (i32, i32, i32) {
    %c0_i32 = arith.constant 0 : i32
    %c0_i32_0 = arith.constant 0 : i32
    %c0_i32_1 = arith.constant 0 : i32
    %c0_i32_2 = arith.constant 0 : i32
    return %c0_i32, %c0_i32_0, %c0_i32_1 : i32, i32, i32
  }
  func.func @transform_3(%arg0: i32) -> (i32, i32, i32) {
    %c0_i32 = arith.constant 0 : i32
    %c0_i32_0 = arith.constant 0 : i32
    %c0_i32_1 = arith.constant 0 : i32
    %c0_i32_2 = arith.constant 0 : i32
    return %c0_i32, %c0_i32_0, %c0_i32_1 : i32, i32, i32
  }
  func.func @transform_4(%arg0: i32) -> (i32, i32) {
    %c0_i32 = arith.constant 0 : i32
    %c0_i32_0 = arith.constant 0 : i32
    %c0_i32_1 = arith.constant 0 : i32
    return %c0_i32, %c0_i32_0 : i32, i32
  }
  func.func @transform_5(%arg0: i32) -> (i32, i32, i32) {
    %c0_i32 = arith.constant 0 : i32
    %c0_i32_0 = arith.constant 0 : i32
    %c0_i32_1 = arith.constant 0 : i32
    return %arg0, %c0_i32, %c0_i32_0 : i32, i32, i32
  }
  func.func @transform_6(%arg0: i32) -> (i32, i32, i32) {
    %c0_i32 = arith.constant 0 : i32
    %c0_i32_0 = arith.constant 0 : i32
    %c0_i32_1 = arith.constant 0 : i32
    return %arg0, %c0_i32, %c0_i32_0 : i32, i32, i32
  }
}

</mosaic_0001>

<bundles_post_ra>
// kernel: tpu_custom_call.1
= control target key start
LH: loop header
LB: loop body
LE: loop exit
PB: predicated region body
PF: predicated region fallthrough
CT: control target
= control target key end

     0   :  { %s7114_s0 = inlined_call_operand.hbm [shape: f32[4,16,32], index: 0, kind: input, shape index: {}]   ;;  %s7115_s1 = inlined_call_operand.hbm [shape: f32[4,8,32], index: 1, kind: input, shape index: {}]   ;;  %s7116_s2 = inlined_call_operand.hbm [shape: f32[4,32,32], index: 2, kind: input, shape index: {}]   ;;  %s7117_s3 = inlined_call_operand.hbm [shape: f32[4,32,32], index: 3, kind: input, shape index: {}]   ;;  %s7118_s4 = inlined_call_operand.hbm [shape: f32[16,32], index: 4, kind: input, shape index: {}]   ;;  %s7119_s5 = inlined_call_operand.hbm [shape: f32[4,16,32], index: 5, kind: output, shape index: {0}]   ;;  %s7120_s6 = inlined_call_operand.hbm [shape: f32[4,8,32], index: 6, kind: output, shape index: {1}]  }
   0x1   :  { %7126 = sst [smem:[#allocation20_spill]] %s7114_s0 }
   0x2   :  { %7127 = sst [smem:[#allocation21_spill]] %s7116_s2 }
   0x3   :  { %7128 = sst [smem:[#allocation22_spill]] %s7117_s3 }
   0x4   :  { %7129 = sst [smem:[#allocation23_spill]] %s7118_s4 }
   0x5   :  { %12 = vsyncpa [#allocation3], 0 }
   0x6   :  { %14 = vsyncpa [#allocation3 + $0x1], 0 }
   0x7   :  { %15 = vsyncpa [#allocation6], 0 }
   0x8   :  { %17 = vsyncpa [#allocation6 + $0x1], 0 }
   0x9   :  { %18 = vsyncpa [#allocation9], 0 }
   0xa   :  { %19 = vsyncpa [#allocation4], 0 }
   0xb   :  { %21 = vsyncpa [#allocation4 + $0x1], 0 }
   0xc   :  { %22 = vsyncpa [#allocation13], 0 }
   0xd   :  { %24 = vsyncpa [#allocation13 + $0x1], 0  ;;  %s6253_s21 = smov 0   ;;  %s6255_s22 = smov 0  }
   0xe   :  { %s6257_s23 = smov 0   ;;  %s6259_s24 = smov 0  }
   0xf LB: > { %s6274_s25 = sadd.s32 4294967295, %s6199_s24   ;;  %s4901_s26 = sadd.s32 4294967294, %s6199_s24   ;;  %s6199_s24 = sphi %s6259_s24, %s7157_s24   ;;  %s6195_s23 = sphi %s6257_s23, %s7156_s23   ;;  %s6191_s22 = sphi %s6255_s22, %s7155_s22   ;;  %s6187_s21 = sphi %s6253_s21, %s7154_s21  }
  0x10   : > { %p50_p0 = scmp.ne.s32.totalorder %s6191_s22, %s6187_s21  ;;  %p7121_p1 = scmp.eq.s32.totalorder %s6274_s25, 0 }
  0x11   : > { %p169_p3 = scmp.eq.s32.totalorder %s4901_s26, 1  ;;  %p4902_p5 = scmp.ge.s32.totalorder %s6199_s24, 1 }
  0x12   : > { %p6283_p4 = por %p7121_p1, %p50_p0  ;;  %p202_p7 = scmp.lt.s32.totalorder %s6199_s24, 3 }
  0x13   : > { %p6288_p6 = por %p169_p3, %p50_p0  ;;  %s6201_s30 = smov [#allocation7]  }
  0x14   : > { %s7130_s27 = scalar_select %p6283_p4, 1, 0 }
  0x15   : > { %s7131_s28 = scalar_select %p6288_p6, 1, 0 }
  0x16   : > { %p6293_p8 = pnand %p4902_p5, %p202_p7  ;;  %s214_s7 = sshll.u32 %s6201_s30, 4  ;;  %s6297_s7 = int_to_ptr.vmem [resolvable:$true] %s214_s7 }
  0x17   : > { %s6202_s9 = smov [#allocation8]   ;;  %s6203_s11 = smov [#allocation10]  }
  0x18   : > { %s7132_s29 = scalar_select %p6293_p8, 1, 0 }
  0x19   : > { %p5694_p9 = pneg %p6293_p8  ;;  %s227_s10 = sshll.u32 %s6202_s9, 4  ;;  %s6308_s10 = int_to_ptr.vmem [resolvable:$true] %s227_s10 }
  0x1a   : > { %s6310_s12 = sshll.u32 %s6203_s11, 4  ;;  %s7134_s2 = sld [smem:[#allocation21_spill]]  ;;  %s241_s12 = int_to_ptr.vmem [resolvable:$true] %s6310_s12 }
  0x1b   : > { %p6304_p11 = pnand %p5694_p9, %p7121_p1 }
  0x1d   : > { %p6320_p13 = pneg %p6304_p11 }
  0x20   : > { %s5945_s15 = scalar_lea.hbm %s7134_s2, 2048 }
  0x21   : > { %p5946_p12 = scmp.ne.s32.totalorder %s7134_s2, %s5945_s15  ;;  %p5952_p5 = scmp.lt.u32.totalorder %s5945_s15, %s7134_s2 }
  0x23   : > { %p5948_p0 = pnand %p6320_p13, %p5946_p12 }
  0x25   : > { %p5949_p3 = pneg %p5948_p0 }
  0x27   : > { %p5954_p7 = pnand %p5952_p5, %p5949_p3 }
  0x29   : > { %5957 = shalt.err (!%p5954_p7)
}
  0x2a   : > { %s5958_s26 = scalar_lea.vmem %s6297_s7, 2048  ;;  %p5966_p2 = scmp.lt.s32.totalorder %s6297_s7, %s6297_s7 }
  0x2b   : > { %p5959_p9 = scmp.ne.s32.totalorder %s6297_s7, %s5958_s26  ;;  %p5967_p6 = scmp.lt.s32.totalorder %s5958_s26, %s5958_s26 }
  0x2d   : > { %p5961_p10 = pnand %p5959_p9, %p6320_p13  ;;  %p5968_p12 = por %p5967_p6, %p5966_p2 }
  0x2f   : > { %p5962_p1 = pneg %p5961_p10 }
  0x31   : > { %p5969_p0 = pnand %p5968_p12, %p5962_p1 }
  0x33   : > { %5972 = shalt.err (!%p5969_p0)
}
  0x34   : > { %s7124_s30 = smov 128   ;;  %s6205_s9 = smov 8  }
  0x35   : > { %5697 = dma.hbm_to_vmem [thread:$0]  (!%p6304_p11), %s7134_s2, 2048, %s6297_s7, [#allocation6], %s7124_s30, %s7124_s30, %s6205_s9  }
  0x36   : > { %s7136_s3 = sld [smem:[#allocation22_spill]] }
  0x3c   : > { %s5973_s16 = scalar_lea.hbm %s7136_s3, 2048 }
  0x3d   : > { %p5974_p1 = scmp.ne.s32.totalorder %s7136_s3, %s5973_s16  ;;  %p5980_p10 = scmp.lt.u32.totalorder %s5973_s16, %s7136_s3 }
  0x3f   : > { %p5976_p2 = pnand %p5974_p1, %p6320_p13 }
  0x41   : > { %p5977_p6 = pneg %p5976_p2 }
  0x43   : > { %p5982_p3 = pnand %p5980_p10, %p5977_p6 }
  0x45   : > { %5985 = shalt.err (!%p5982_p3)
}
  0x46   : > { %s5986_s7 = scalar_lea.vmem %s6308_s10, 2048  ;;  %p5994_p12 = scmp.lt.s32.totalorder %s6308_s10, %s6308_s10 }
  0x47   : > { %p5987_p5 = scmp.ne.s32.totalorder %s6308_s10, %s5986_s7  ;;  %p5995_p0 = scmp.lt.s32.totalorder %s5986_s7, %s5986_s7 }
  0x49   : > { %p5989_p7 = pnand %p5987_p5, %p6320_p13  ;;  %p5996_p1 = por %p5995_p0, %p5994_p12 }
  0x4b   : > { %p5990_p9 = pneg %p5989_p7 }
  0x4d   : > { %p5997_p2 = pnand %p5996_p1, %p5990_p9 }
  0x4f   : > { %6000 = shalt.err (!%p5997_p2)
}
  0x50   : > { %5700 = dma.hbm_to_vmem [thread:$0]  (!%p6304_p11), %s7136_s3, 2048, %s6308_s10, [#allocation9], %s7124_s30, %s7124_s30, %s6205_s9  }
  0x51   : > { %s7137_s4 = sld [smem:[#allocation23_spill]] }
  0x57   : > { %s6001_s16 = scalar_lea.hbm %s7137_s4, 256 }
  0x58   : > { %p6002_p6 = scmp.ne.s32.totalorder %s7137_s4, %s6001_s16  ;;  %p6008_p5 = scmp.lt.u32.totalorder %s6001_s16, %s7137_s4 }
  0x5a   : > { %p6004_p10 = pnand %p6002_p6, %p6320_p13 }
  0x5c   : > { %p6005_p3 = pneg %p6004_p10 }
  0x5e   : > { %p6010_p7 = pnand %p6008_p5, %p6005_p3 }
  0x60   : > { %6013 = shalt.err (!%p6010_p7)
}
  0x61   : > { %s6014_s7 = scalar_lea.vmem %s241_s12, 256  ;;  %p6022_p1 = scmp.lt.s32.totalorder %s241_s12, %s241_s12 }
  0x62   : > { %p6015_p9 = scmp.ne.s32.totalorder %s241_s12, %s6014_s7  ;;  %p6023_p2 = scmp.lt.s32.totalorder %s6014_s7, %s6014_s7 }
  0x64   : > { %p6017_p12 = pnand %p6015_p9, %p6320_p13  ;;  %p6024_p4 = por %p6023_p2, %p6022_p1 }
  0x66   : > { %p6018_p0 = pneg %p6017_p12 }
  0x68   : > { %p6025_p8 = pnand %p6024_p4, %p6018_p0 }
  0x6a   : > { %6028 = shalt.err (!%p6025_p8)
}
  0x6b   : > { %5703 = dma.hbm_to_vmem [thread:$0]  (!%p6304_p11), %s7137_s4, 256, %s241_s12, [#allocation9], %s7124_s30, %s7124_s30, %s6205_s9  }
  0x6c   : > { %s6393_s18 = sadd.s32 1, %s6199_s24   ;;  %s37_s13 = sadd.s32 1, %s6195_s23 }
  0x6d   : > { %s34_s8 = ssub.s32 %s6199_s24, %s6393_s18  ;;  %p44_p8 = scmp.ne.s32.totalorder %s6195_s23, %s6191_s22 }
  0x6e   : > { %p35_p4 = scmp.eq.s32.totalorder %s34_s8, 0  ;;  %p45_p13 = scmp.eq.s32.totalorder %s6199_s24, 0 }
  0x6f   : > { %p5721_p6 = scmp.lt.s32.totalorder %s6199_s24, 2  ;;  %p7138_p3 = scmp.eq.s32.totalorder %s6274_s25, 1 }
  0x70   : > { %s6403_s14 = scalar_select %p35_p4, %s6195_s23, %s37_s13  }
  0x71   : > { %p46_p10 = por %p45_p13, %p44_p8  ;;  %p6407_p5 = por %p7138_p3, %p44_p8 }
  0x72   : > { %s6412_s16 = sand.u32 1, %s6195_s23   ;;  %s5058_s12 = sshll.u32 %s6199_s24, 9 }
  0x73   : > { %s4907_s17 = sshll.u32 %s6412_s16, 5  ;;  %s7140_s0 = sld [smem:[#allocation20_spill]] }
  0x74   : > { %s258_s7 = scalar_lea.vmem [#allocation2], %s4907_s17  ;;  %p6421_p11 = pnand %p5721_p6, %p46_p10 }
  0x75   : > { %s266_s10 = sshll.u32 %s258_s7, 4  ;;  %s255_s13 = scalar_lea.sflag [#allocation3], %s6412_s16  ;;  %s6425_s10 = int_to_ptr.vmem [resolvable:$true] %s266_s10 }
  0x76   : > { %p6031_p9 = pneg %p6421_p11 }
  0x79   : > { %s6419_s26 = scalar_lea.hbm %s7140_s0, %s5058_s12  ;;  %s6034_s19 = scalar_lea.hbm %s7140_s0, 1024 }
  0x7a   : > { %s6029_s30 = scalar_lea.hbm %s6419_s26, 512  ;;  %p6035_p1 = scmp.lt.u32.totalorder %s6419_s26, %s7140_s0 }
  0x7b   : > { %p6030_p7 = scmp.ne.s32.totalorder %s6419_s26, %s6029_s30  ;;  %p6036_p2 = scmp.lt.u32.totalorder %s6034_s19, %s6029_s30 }
  0x7c   : > { %p6038_p8 = scmp.lt.u32.totalorder %s6029_s30, %s6419_s26 }
  0x7d   : > { %p6032_p12 = pnand %p6031_p9, %p6030_p7  ;;  %p6037_p4 = por %p6036_p2, %p6035_p1 }
  0x7f   : > { %p6033_p0 = pneg %p6032_p12  ;;  %p6039_p13 = por %p6038_p8, %p6037_p4 }
  0x81   : > { %p6040_p6 = pnand %p6039_p13, %p6033_p0 }
  0x83   : > { %6043 = shalt.err (!%p6040_p6)
}
  0x84   : > { %s6044_s8 = scalar_lea.vmem %s6425_s10, 512  ;;  %s6206_s12 = smov [#allocation2]  }
  0x85   : > { %p6045_p10 = scmp.ne.s32.totalorder %s6425_s10, %s6044_s8  ;;  %s6049_s17 = sshll.u32 %s6206_s12, 4  ;;  %s6050_s17 = int_to_ptr.vmem [resolvable:$false] %s6049_s17 }
  0x86   : > { %s6051_s20 = scalar_lea.vmem %s6050_s17, 1024  ;;  %p6052_p12 = scmp.lt.s32.totalorder %s6425_s10, %s6050_s17 }
  0x87   : > { %p6047_p3 = pnand %p6045_p10, %p6031_p9  ;;  %p6053_p1 = scmp.lt.s32.totalorder %s6051_s20, %s6044_s8 }
  0x89   : > { %p6048_p7 = pneg %p6047_p3  ;;  %p6054_p2 = por %p6053_p1, %p6052_p12 }
  0x8b   : > { %p6055_p4 = pnand %p6054_p2, %p6048_p7 }
  0x8d   : > { %6058 = shalt.err (!%p6055_p4)
}
  0x8e   : > { %s7142_s30 = smov 128   ;;  %s4911_s19 = sshll.u32 %s6412_s16, 4 }
  0x8f   : > { %5707 = dma.hbm_to_vmem [thread:$0]  (!%p6421_p11), %s6419_s26, 512, %s6425_s10, %s255_s13, %s7142_s30, %s7142_s30, %s6205_s9  }
  0x90   : > { %s5059_s7 = sshll.u32 %s6199_s24, 8  ;;  %s280_s20 = scalar_lea.vmem [#allocation5], %s4911_s19 }
  0x91   : > { %s6464_s17 = scalar_lea.hbm %s7115_s1, %s5059_s7  ;;  %s287_s0 = sshll.u32 %s280_s20, 4  ;;  %s6466_s0 = int_to_ptr.vmem [resolvable:$true] %s287_s0 }
  0x92   : > { %s7143_s2 = sand.u32 1, %s6199_s24   ;;  %s6059_s4 = scalar_lea.hbm %s6464_s17, 256 }
  0x93   : > { %s6470_s3 = scalar_lea.sflag [#allocation6], %s7143_s2  ;;  %p6060_p0 = scmp.ne.s32.totalorder %s6464_s17, %s6059_s4 }
  0x94   : > { %s6064_s10 = scalar_lea.hbm %s7115_s1, 512  ;;  %p6065_p6 = scmp.lt.u32.totalorder %s6464_s17, %s7115_s1 }
  0x95   : > { %p6062_p8 = pnand %p6060_p0, %p6031_p9  ;;  %p6066_p10 = scmp.lt.u32.totalorder %s6064_s10, %s6059_s4 }
  0x96   : > { %p6068_p7 = scmp.lt.u32.totalorder %s6059_s4, %s6464_s17 }
  0x97   : > { %p6063_p13 = pneg %p6062_p8  ;;  %p6067_p3 = por %p6066_p10, %p6065_p6 }
  0x99   : > { %p6069_p12 = por %p6068_p7, %p6067_p3 }
  0x9b   : > { %p6070_p1 = pnand %p6069_p12, %p6063_p13 }
  0x9d   : > { %6073 = shalt.err (!%p6070_p1)
}
  0x9e   : > { %s6074_s2 = scalar_lea.vmem %s6466_s0, 256  ;;  %s6207_s19 = smov [#allocation5]  }
  0x9f   : > { %p6075_p2 = scmp.ne.s32.totalorder %s6466_s0, %s6074_s2  ;;  %s6079_s8 = sshll.u32 %s6207_s19, 4  ;;  %s6080_s8 = int_to_ptr.vmem [resolvable:$false] %s6079_s8 }
  0xa0   : > { %s6081_s12 = scalar_lea.vmem %s6080_s8, 512  ;;  %p6082_p8 = scmp.lt.s32.totalorder %s6466_s0, %s6080_s8 }
  0xa1   : > { %p6077_p4 = pnand %p6075_p2, %p6031_p9  ;;  %p6083_p6 = scmp.lt.s32.totalorder %s6081_s12, %s6074_s2 }
  0xa3   : > { %p6078_p0 = pneg %p6077_p4  ;;  %p6084_p10 = por %p6083_p6, %p6082_p8 }
  0xa5   : > { %p6085_p3 = pnand %p6084_p10, %p6078_p0 }
  0xa7   : > { %6088 = shalt.err (!%p6085_p3)
}
  0xa8   : > { %5710 = dma.hbm_to_vmem [thread:$0]  (!%p6421_p11), %s6464_s17, 256, %s6466_s0, %s6470_s3, %s7142_s30, %s7142_s30, %s6205_s9  }
  0xa9   : > { %p7144_p9 = scmp.ne.s32.totalorder %s7132_s29, 0 }
  0xaa   : > { %s6502_s4 = sand.u32 (!%p7144_p9), 1, %s6191_s22   ;;  %p7145_p13 = scmp.ne.s32.totalorder (!%p7144_p9), %s7130_s27, 0 }
  0xab   : > { %299 = sbr.rel (%p7144_p9) target bundleno = 6438 (0x1926), region = 40  ;;  %s4915_s20 = sshll.u32 (!%p7144_p9), %s6502_s4, 5 }
  0xac   : > { %s302_s16 = scalar_lea.sflag (!%p7144_p9), [#allocation3], %s6502_s4  ;;  %s6508_s11 = scalar_lea.vmem (!%p7144_p9), [#allocation2], %s4915_s20 }
  0xb2   : > { %6162 = dma.done.wait (%p7145_p13), %s302_s16, 512  }
  0xb3   : > { %6164 = vsyncadd (%p7145_p13), %s302_s16, 4294966784  ;;  %s310_s0 = sand.u32 1, %s6274_s25   ;;  %s4916_s3 = sshll.u32 %s6502_s4, 4 }
  0xb4   : > { %s311_s29 = scalar_lea.sflag [#allocation6], %s310_s0  ;;  %s6518_s9 = scalar_lea.vmem [#allocation5], %s4916_s3 }
  0xb5   : > { %6166 = dma.done.wait (%p7145_p13), %s311_s29, 256  }
  0xb6   : > { %6168 = vsyncadd (%p7145_p13), %s311_s29, 4294967040  ;;  %p7146_p11 = scmp.eq.s32.totalorder %s6274_s25, 0 }
  0xb8   : > { %6170 = dma.done.wait (%p7146_p11), [#allocation6], 2048   ;;  %p7147_p7 = pmov %p7146_p11 }
  0xba   : > { %6172 = vsyncadd (%p7147_p7), [#allocation6], 4294965248  ;;  %p7148_p12 = pmov %p7147_p7 }
  0xbb   : > { %p7149_p1 = pmov %p7147_p7 }
  0xbc   : > { %6174 = dma.done.wait (%p7148_p12), [#allocation9], 2304  }
  0xbd   : > { %6176 = vsyncadd (%p7149_p1), [#allocation9], 4294964992  ;;  %v375_v0 = vld [vmem:[#allocation7] sm:$0xff]  ;;  %v376_v1 = vld [vmem:[#allocation7 + $0x8] sm:$0xff]  ;;  %vm404_vm0 = vcmask 261120   ;;  %vm670_vm1 = vcmask 64512  }
  0xbe   : > { %v380_v2 = vld [vmem:[#allocation7 + $0x20] sm:$0xff]  ;;  %v5552_v3 = vpack.c.bf16 %v376_v1, %v375_v0  ;;  %v381_v4 = vld [vmem:[#allocation7 + $0x28] sm:$0xff]  ;;  %v377_v5 = vld [vmem:[#allocation7 + $0x10] sm:$0xff]  ;;  %s6208_s27 = smov 120   ;;  %s6209_s30 = smov 112   ;;  %vm6212_vm2 = vmmov 0  }
  0xbf   : > { %v378_v6 = vld [vmem:[#allocation7 + $0x18] sm:$0xff]  ;;  %v5560_v7 = vpack.c.bf16 %v381_v4, %v380_v2  ;;  %v382_v9 = vld [vmem:[#allocation7 + $0x30] sm:$0xff]  ;;  %v6533_v11 = vld [vmem:[%s6508_s11] sm:$0xff]  ;;  %s6210_s17 = smov 104   ;;  %vm3128_vm4 = vcmask 130048   ;;  %s357_s26 = scalar_lea.vmem [#allocation11], %s4915_s20 }
  0xc0   : > { %v5556_v8 = vpack.c.bf16 %v378_v6, %v377_v5  ;;  %v383_v10 = vld [vmem:[#allocation7 + $0x38] sm:$0xff]  ;;  %5553 = vmatprep.subr.bf16.mxu0 %v5552_v3  ;;  %5241 = vmatprep.mubr.msk.f32.mxu0 %vm404_vm0, %v6533_v11  ;;  %v6538_v13 = vld [vmem:[%s6518_s9] sm:$0xff]  ;;  %v6543_v14 = vld [vmem:[%s6508_s11 + $0x8] sm:$0xff]  ;;  %s5061_s10 = sshll.u32 %s6274_s25, 9  ;;  %s4729_s19 = sshll.u32 %s357_s26, 4  ;;  %s7026_s19 = int_to_ptr.vmem [resolvable:$true] %s4729_s19 }
  0xc1   : > { %v5564_v12 = vpack.c.bf16 %v383_v10, %v382_v9  ;;  %5561 = vmatprep.subr.bf16.mxu1 %v5560_v7  ;;  %5555 = vmatpush3.bf16.msra.mxu0 %v5552_v3  ;;  %v6546_v15 = vld [vmem:[%s6518_s9 + $0x8] sm:$0xff]  ;;  %v6549_v16 = vld [vmem:[%s6508_s11 + $0x10] sm:$0xff]  ;;  %v385_v18 = vld [vmem:[#allocation7 + $0x40] sm:$0xff]  ;;  %s7024_s2 = scalar_lea.hbm %s7119_s5, %s5061_s10  ;;  %s4710_s8 = scalar_lea.sflag [#allocation4], %s6502_s4 }
  0xc2   : > { %5563 = vmatpush3.bf16.msra.mxu1 %v5560_v7  ;;  %5557 = vmatprep.subr.bf16.mxu0 %v5556_v8  ;;  %v6558_v17 = vld [vmem:[%s6508_s11 + $0x18] sm:$0xff]  ;;  %v386_v19 = vld [vmem:[#allocation7 + $0x48] sm:$0xff]  ;;  %v387_v20 = vld [vmem:[#allocation7 + $0x50] sm:$0xff]  ;;  %s6089_s12 = scalar_lea.vmem %s7026_s19, 512  ;;  %s6214_s20 = smov [#allocation11]  }
  0xc3   : > { %5565 = vmatprep.subr.bf16.mxu1 %v5564_v12  ;;  %5255 = vmatprep.mubr.msk.f32.mxu1 %vm404_vm0, %v6538_v13  ;;  %v5568_v21 = vpack.c.bf16 %v386_v19, %v385_v18  ;;  %v388_v22 = vld [vmem:[#allocation7 + $0x58] sm:$0xff]  ;;  %v4922_v24 = vld [vmem:[#allocation10] ss:$0 sm:$0xff]  ;;  %v4927_v26 = vld [vmem:[#allocation10 + $0x1] ss:$0 sm:$0xff]  ;;  %p6090_p2 = scmp.ne.s32.totalorder %s7026_s19, %s6089_s12  ;;  %s6093_s16 = sshll.u32 %s6214_s20, 4  ;;  %s6094_s16 = int_to_ptr.vmem [resolvable:$false] %s6093_s16 }
  0xc4   : > { %v5572_v23 = vpack.c.bf16 %v388_v22, %v387_v20  ;;  %v4930_v49 = vld [vmem:[#allocation10 + $0x2] ss:$0 sm:$0xff]  ;;  %vm6816_vm3 = vmpackc.low %vm670_vm1, %vm670_vm1  ;;  %p6096_p8 = scmp.lt.s32.totalorder %s7026_s19, %s6094_s16 }
  0xc5   : > { %5559 = vmatpush3.bf16.msra.mxu0 %v5556_v8  ;;  %p6091_p4 = pnand %p6090_p2, %p6407_p5 }
  0xc6   : > { %5567 = vmatpush3.bf16.msra.mxu1 %v5564_v12  ;;  %5569 = vmatprep.subr.bf16.mxu0 %v5568_v21 }
  0xc7   : > { %p6092_p0 = pneg %p6091_p4 }
  0xc8   : > { %5242 = vmatmul.mubr.msk.f32.vlgmr.msra.gmra.mrb[0].mxu0 %vm404_vm0, %v6543_v14 }
  0xc9   : > { %5256 = vmatmul.mubr.msk.f32.vlgmr.msra.gmra.mrb[0].mxu1 %vm404_vm0, %v6546_v15  ;;  %5244 = vmatprep.mubr.msk.f32.mxu0 %vm404_vm0, %v6549_v16 }
  0xca   : > { %5571 = vmatpush3.bf16.msra.mxu0 %v5568_v21 }
  0xcb   : > { %5573 = vmatprep.subr.bf16.mxu0 %v5572_v23 }
  0xcc   : > { %5245 = vmatmul.mubr.msk.f32.gmra.mrb[2].mxu0 %vm404_vm0, %v6558_v17 }
  0xcd   : > { %5266 = vmatprep.mubr.msk.f32.mxu0 %vm404_vm0, %v6538_v13 }
  0xce   : > { %5575 = vmatpush3.bf16.msra.mxu0 %v5572_v23 }
  0xd1   : > { %5267 = vmatmul.mubr.msk.f32.vlgmr.msra.gmra.mrb[4].mxu0 %vm404_vm0, %v6546_v15 }
 0x19b   : > { %v5243_v25 = vpop.f32.mrb[0].mxu0 }
 0x19c   : > { %v5257_v27 = vpop.f32.mrb[0].mxu1  ;;  %v483_v28 = vpop.f32.mrb[1].mxu0  ;;  %v489_v31 = vadd.f32 %v5243_v25, %v4922_v24 }
 0x19d   : > { %v484_v29 = vadd.f32 %v4922_v24, %v483_v28  ;;  %v578_v30 = vpop.f32.mrb[1].mxu1  ;;  %v6568_v35 = vadd.f32 %v5257_v27, %v4927_v26 }
 0x19e   : > { %v6564_v32 = vadd.f32 %v4927_v26, %v578_v30  ;;  %v6576_v38 = vmul.f32 0.35355338, %v489_v31 }
 0x19f   : > { %v6566_v33 = vmul.f32 0.35355338, %v484_v29  ;;  %v5246_v34 = vpop.f32.mrb[2].mxu0 }
 0x1a0   : > { %5269 = vmatprep.subr.msk.mxu1 %vm670_vm1, %v6564_v32  ;;  %v493_v36 = vpop.f32.mrb[3].mxu0  ;;  %v499_v39 = vadd.f32 %v5246_v34, %v4922_v24 }
 0x1a1   : > { %v494_v37 = vadd.f32 %v4922_v24, %v493_v36  ;;  %5270 = vmatpush3.xpose.msk.msra.mxu1 %vm670_vm1, %v6564_v32  ;;  %5271 = vmatprep.mubr.msk.f32.mxu1 %vm670_vm1, %v6566_v33 }
 0x1a2   : > { %5274 = vmatprep.subr.msk.mxu1 %vm670_vm1, %v6568_v35  ;;  %v6590_v41 = vmul.f32 0.35355338, %v499_v39 }
 0x1a3   : > { %v6582_v40 = vmul.f32 0.35355338, %v494_v37 }
 0x1a4   : > { %5272 = vmatmul.mubr.msk.f32.vlgmr.msra.gmra.mrb[2].mxu1 %vm670_vm1, %v6576_v38  ;;  %v5268_v48 = vpop.f32.mrb[4].mxu0 }
 0x1a5   : > { %5275 = vmatpush3.xpose.msk.msra.mxu1 %vm670_vm1, %v6568_v35  ;;  %1132 = vrot.lane.b32.xlu1 %v6582_v40, %s6208_s27  ;;  %v6602_v50 = vadd.f32 %v5268_v48, %v4930_v49  ;;  %v657_v62 = vpop.f32.mrb[5].mxu0 }
 0x1a6   : > { %5276 = vmatprep.mubr.msk.f32.mxu1 %vm670_vm1, %v6582_v40  ;;  %v6613_v63 = vadd.f32 %v4930_v49, %v657_v62 }
 0x1a7   : > { %5284 = vmatprep.subr.mxu1 %v6602_v50 }
 0x1a8   : > { %5277 = vmatmul.mubr.msk.f32.vlgmr.msra.gmra.mrb[4].mxu1 %vm670_vm1, %v6590_v41  ;;  %5279 = vmatprep.subr.mxu0 %v6613_v63 }
 0x1a9   : > { %5285 = vmatpush3.msra.mxu1 %v6602_v50  ;;  %5280 = vmatpush3.msra.mxu0 %v6613_v63 }
 0x217   : > { %v1133_v0 = vpop.permute.xlu1 %1132 }
 0x277   : > { %v6596_v42 = vpop.f32.mrb[2].mxu1 }
 0x278   : > { %v6598_v43 = vpop.f32.mrb[3].mxu1  ;;  %v842_v20 = vsel %vm670_vm1, %v6596_v42, -inf }
 0x279   : > { %v839_v34 = vsel %vm670_vm1, %v6598_v43, -inf }
 0x27b   : > { %v5278_v44 = vpop.f32.mrb[4].mxu1 }
 0x27c   : > { %v830_v45 = vpop.f32.mrb[5].mxu1  ;;  %v848_v47 = vsel %vm670_vm1, %v5278_v44, -inf }
 0x27d   : > { %v845_v46 = vsel %vm670_vm1, %v830_v45, -inf }
 0x27e   : > { %846 = vmax.xlane.f32.xlu0 %v845_v46 }
 0x282   : > { %849 = vmax.xlane.f32.xlu0 %v848_v47 }
 0x298   : > { %1136 = vrot.lane.b32.xlu0 %v6568_v35, %s6208_s27 }
 0x30b   : > { %v847_v51 = vpop.xlane.xlu0 %846 }
 0x30c   : > { %v853_v52 = vsub.f32 %v830_v45, %v847_v51 }
 0x30e   : > { %v859_v55 = vmul.f32 1.442695, %v853_v52 }
 0x30f   : > { %v850_v53 = vpop.xlane.xlu0 %849 }
 0x310   : > { %v854_v54 = vsub.f32 %v5278_v44, %v850_v53 }
 0x312   : > { %v861_v56 = vmul.f32 1.442695, %v854_v54 }
 0x313   : > { %v1137_v57 = vpop.permute.xlu0 %1136 }
 0x314   : > { %5831 = vpow2.f32 %v861_v56  ;;  %5294 = vmatprep.subr.msk.mxu1 %vm670_vm1, %v1137_v57 }
 0x315   : > { %5833 = vpow2.f32 %v859_v55 }
 0x31e   : > { %v5832_v58 = vpop.eup %5831 }
 0x31f   : > { %v872_v59 = vsel %vm670_vm1, %v5832_v58, 0.0  ;;  %v5834_v60 = vpop.eup %5833 }
 0x320   : > { %873 = vadd.xlane.f32.xlu1 %v872_v59  ;;  %v869_v61 = vsel %vm670_vm1, %v5834_v60, 0.0 }
 0x324   : > { %870 = vadd.xlane.f32.xlu1 %v869_v61 }
 0x335   : > { %1134 = vrot.lane.b32.xlu1 %v6590_v41, %s6208_s27 }
 0x3ad   : > { %v874_v1 = vpop.xlane.xlu1 %873 }
 0x3ae   : > { %5835 = vrcp.f32 %v874_v1 }
 0x3b1   : > { %v871_v2 = vpop.xlane.xlu1 %870 }
 0x3b2   : > { %5837 = vrcp.f32 %v871_v2 }
 0x3b5   : > { %v1135_v7 = vpop.permute.xlu1 %1134 }
 0x3b8   : > { %v5836_v3 = vpop.eup %5835 }
 0x3b9   : > { %v882_v6 = vmul.f32 %v5836_v3, %v5832_v58 }
 0x3bc   : > { %v5838_v4 = vpop.eup %5837 }
 0x3bd   : > { %v881_v5 = vmul.f32 %v5838_v4, %v5834_v60 }
 0x3bf   : > { %5286 = vmatprep.mubr.msk.f32.mxu1 %vm670_vm1, %v881_v5 }
 0x3c0   : > { %5287 = vmatmul.mubr.msk.f32.vlgmr.msra.gmra.mrb[6].mxu1 %vm670_vm1, %v882_v6 }
 0x3c1   : > { %5295 = vmatpush3.xpose.msk.msra.mxu1 %vm670_vm1, %v1137_v57  ;;  %5296 = vmatprep.mubr.msk.f32.mxu1 %vm670_vm1, %v1133_v0 }
 0x3c4   : > { %5297 = vmatmul.mubr.msk.f32.vlgmr.msra.gmra.mrb[8].mxu1 %vm670_vm1, %v1135_v7 }
 0x493   : > { %v6622_v8 = vpop.f32.mrb[6].mxu1 }
 0x494   : > { %v6624_v9 = vpop.f32.mrb[7].mxu1 }
 0x497   : > { %v5298_v10 = vpop.f32.mrb[8].mxu1 }
 0x498   : > { %v1210_v12 = vpop.f32.mrb[9].mxu1  ;;  %v1228_v18 = vsel %vm670_vm1, %v5298_v10, -inf }
 0x499   : > { %1229 = vmax.xlane.f32.xlu0 %v1228_v18  ;;  %v1225_v19 = vsel %vm670_vm1, %v1210_v12, -inf }
 0x49a   : > { %1226 = vmax.xlane.f32.xlu1 %v1225_v19 }
 0x4ab   : > { %1349 = vrot.lane.b32.xlu1 %v6602_v50, %s6208_s27 }
 0x4af   : > { %1627 = vrot.lane.b32.xlu1 %v6566_v33, %s6209_s30 }
 0x4b3   : > { %1629 = vrot.lane.b32.xlu1 %v6576_v38, %s6209_s30 }
 0x4b7   : > { %1718 = vrot.lane.b32.xlu1 %v6568_v35, %s6209_s30 }
 0x4bb   : > { %1716 = vrot.lane.b32.xlu1 %v6590_v41, %s6209_s30 }
 0x4df   : > { %843 = vmax.xlane.f32.xlu1 %v842_v20 }
 0x4f0   : > { %1045 = vrot.lane.b32.xlu1 %v6566_v33, %s6208_s27 }
 0x4f4   : > { %1047 = vrot.lane.b32.xlu1 %v6576_v38, %s6208_s27 }
 0x526   : > { %v1230_v21 = vpop.xlane.xlu0 %1229 }
 0x527   : > { %v1234_v22 = vsub.f32 %v5298_v10, %v1230_v21  ;;  %v1227_v23 = vpop.xlane.xlu1 %1226 }
 0x528   : > { %v1233_v24 = vsub.f32 %v1210_v12, %v1227_v23 }
 0x529   : > { %v1241_v25 = vmul.f32 1.442695, %v1234_v22 }
 0x52a   : > { %v1239_v26 = vmul.f32 1.442695, %v1233_v24 }
 0x52b   : > { %5839 = vpow2.f32 %v1241_v25  ;;  %v1350_v27 = vpop.permute.xlu1 %1349 }
 0x52c   : > { %5304 = vmatprep.subr.mxu1 %v1350_v27  ;;  %5841 = vpow2.f32 %v1239_v26 }
 0x52d   : > { %5305 = vmatpush3.msra.mxu1 %v1350_v27 }
 0x52f   : > { %v1628_v39 = vpop.permute.xlu1 %1627 }
 0x533   : > { %v1630_v46 = vpop.permute.xlu1 %1629 }
 0x535   : > { %v5840_v28 = vpop.eup %5839 }
 0x536   : > { %v1252_v29 = vsel %vm670_vm1, %v5840_v28, 0.0  ;;  %v5842_v30 = vpop.eup %5841 }
 0x537   : > { %1253 = vadd.xlane.f32.xlu0 %v1252_v29  ;;  %v1249_v31 = vsel %vm670_vm1, %v5842_v30, 0.0  ;;  %v1719_v51 = vpop.permute.xlu1 %1718 }
 0x53b   : > { %1250 = vadd.xlane.f32.xlu0 %v1249_v31  ;;  %v1717_v53 = vpop.permute.xlu1 %1716 }
 0x551   : > { %1631 = vrot.lane.b32.xlu0 %v6564_v32, %s6209_s30 }
 0x555   : > { %1714 = vrot.lane.b32.xlu0 %v6582_v40, %s6209_s30 }
 0x56c   : > { %v844_v54 = vpop.xlane.xlu1 %843 }
 0x56d   : > { %v852_v55 = vsub.f32 %v6596_v42, %v844_v54 }
 0x56f   : > { %v857_v58 = vmul.f32 1.442695, %v852_v55 }
 0x570   : > { %v1046_v7 = vpop.permute.xlu1 %1045 }
 0x574   : > { %840 = vmax.xlane.f32.xlu0 %v839_v34  ;;  %v1048_v23 = vpop.permute.xlu1 %1047 }
 0x5c4   : > { %v1254_v36 = vpop.xlane.xlu0 %1253 }
 0x5c5   : > { %5843 = vrcp.f32 %v1254_v36 }
 0x5c8   : > { %v1251_v37 = vpop.xlane.xlu0 %1250 }
 0x5c9   : > { %5845 = vrcp.f32 %v1251_v37 }
 0x5cc   : > { %v1632_v44 = vpop.permute.xlu0 %1631 }
 0x5cd   : > { %5325 = vmatprep.subr.msk.mxu1 %vm670_vm1, %v1632_v44 }
 0x5cf   : > { %v5844_v45 = vpop.eup %5843 }
 0x5d0   : > { %v1262_v49 = vmul.f32 %v5844_v45, %v5840_v28  ;;  %v1715_v52 = vpop.permute.xlu0 %1714 }
 0x5d3   : > { %v5846_v47 = vpop.eup %5845 }
 0x5d4   : > { %v1261_v48 = vmul.f32 %v5846_v47, %v5842_v30 }
 0x5d6   : > { %5306 = vmatprep.mubr.msk.f32.mxu1 %vm670_vm1, %v1261_v48 }
 0x5d7   : > { %5307 = vmatmul.mubr.msk.f32.vlgmr.msra.gmra.mrb[10].mxu1 %vm670_vm1, %v1262_v49 }
 0x5d8   : > { %5326 = vmatpush3.xpose.msk.msra.mxu1 %vm670_vm1, %v1632_v44  ;;  %5327 = vmatprep.mubr.msk.f32.mxu1 %vm670_vm1, %v1628_v39 }
 0x5d9   : > { %5330 = vmatprep.subr.msk.mxu1 %vm670_vm1, %v1719_v51 }
 0x5db   : > { %5328 = vmatmul.mubr.msk.f32.vlgmr.msra.gmra.mrb[12].mxu1 %vm670_vm1, %v1630_v46 }
 0x5dc   : > { %5331 = vmatpush3.xpose.msk.msra.mxu1 %vm670_vm1, %v1719_v51  ;;  %5332 = vmatprep.mubr.msk.f32.mxu1 %vm670_vm1, %v1715_v52 }
 0x5df   : > { %5333 = vmatmul.mubr.msk.f32.vlgmr.msra.gmra.mrb[14].mxu1 %vm670_vm1, %v1717_v53 }
 0x601   : > { %v841_v56 = vpop.xlane.xlu0 %840 }
 0x602   : > { %v851_v57 = vsub.f32 %v6598_v43, %v841_v56 }
 0x604   : > { %v855_v59 = vmul.f32 1.442695, %v851_v57 }
 0x606   : > { %5847 = vpow2.f32 %v855_v59 }
 0x607   : > { %5849 = vpow2.f32 %v857_v58 }
 0x610   : > { %v5848_v60 = vpop.eup %5847 }
 0x611   : > { %v863_v61 = vsel %vm670_vm1, %v5848_v60, 0.0  ;;  %v5850_v62 = vpop.eup %5849 }
 0x612   : > { %864 = vadd.xlane.f32.xlu0 %v863_v61  ;;  %v866_v0 = vsel %vm670_vm1, %v5850_v62, 0.0 }
 0x616   : > { %867 = vadd.xlane.f32.xlu0 %v866_v0 }
 0x62c   : > { %1049 = vrot.lane.b32.xlu0 %v6564_v32, %s6208_s27 }
 0x69f   : > { %v865_v1 = vpop.xlane.xlu0 %864 }
 0x6a0   : > { %5851 = vrcp.f32 %v865_v1 }
 0x6a3   : > { %v868_v42 = vpop.xlane.xlu0 %867 }
 0x6a4   : > { %5853 = vrcp.f32 %v868_v42 }
 0x6a7   : > { %v1050_v43 = vpop.permute.xlu0 %1049 }
 0x6a8   : > { %5289 = vmatprep.subr.msk.mxu0 %vm670_vm1, %v1050_v43 }
 0x6aa   : > { %v5852_v2 = vpop.eup %5851  ;;  %v6669_v3 = vpop.f32.mrb[10].mxu1 }
 0x6ab   : > { %v6671_v4 = vpop.f32.mrb[11].mxu1  ;;  %v879_v5 = vmul.f32 %v5852_v2, %v5848_v60 }
 0x6ad   : > { %5281 = vmatprep.mubr.msk.f32.mxu0 %vm670_vm1, %v879_v5 }
 0x6ae   : > { %v5854_v6 = vpop.eup %5853  ;;  %v5329_v10 = vpop.f32.mrb[12].mxu1 }
 0x6af   : > { %v880_v12 = vmul.f32 %v5854_v6, %v5850_v62  ;;  %v1705_v18 = vpop.f32.mrb[13].mxu1  ;;  %v1804_v19 = vsel %vm670_vm1, %v5329_v10, -inf }
 0x6b0   : > { %1805 = vmax.xlane.f32.xlu0 %v1804_v19  ;;  %v1801_v20 = vsel %vm670_vm1, %v1705_v18, -inf }
 0x6b1   : > { %1802 = vmax.xlane.f32.xlu1 %v1801_v20  ;;  %5282 = vmatmul.mubr.msk.f32.vlgmr.msra.gmra.mrb[6].mxu0 %vm670_vm1, %v880_v12 }
 0x6b2   : > { %5290 = vmatpush3.xpose.msk.msra.mxu0 %vm670_vm1, %v1050_v43  ;;  %5291 = vmatprep.mubr.msk.f32.mxu0 %vm670_vm1, %v1046_v7  ;;  %v5334_v21 = vpop.f32.mrb[14].mxu1 }
 0x6b3   : > { %v1792_v22 = vpop.f32.mrb[15].mxu1  ;;  %v1810_v25 = vsel %vm670_vm1, %v5334_v21, -inf }
 0x6b4   : > { %v1807_v24 = vsel %vm670_vm1, %v1792_v22, -inf }
 0x6b5   : > { %1808 = vmax.xlane.f32.xlu0 %v1807_v24  ;;  %5292 = vmatmul.mubr.msk.f32.vlgmr.msra.gmra.mrb[8].mxu0 %vm670_vm1, %v1048_v23 }
 0x6b9   : > { %1811 = vmax.xlane.f32.xlu0 %v1810_v25 }
 0x6c2   : > { %1845 = vrot.lane.b32.xlu1 %v6613_v63, %s6209_s30 }
 0x6c6   : > { %2118 = vrot.lane.b32.xlu1 %v6564_v32, %s6210_s17 }
 0x6ca   : > { %2114 = vrot.lane.b32.xlu1 %v6566_v33, %s6210_s17 }
 0x73d   : > { %v1806_v26 = vpop.xlane.xlu0 %1805 }
 0x73e   : > { %v1814_v27 = vsub.f32 %v5329_v10, %v1806_v26  ;;  %v1803_v28 = vpop.xlane.xlu1 %1802 }
 0x73f   : > { %v1813_v29 = vsub.f32 %v1705_v18, %v1803_v28 }
 0x740   : > { %v1819_v30 = vmul.f32 1.442695, %v1814_v27 }
 0x741   : > { %v1817_v31 = vmul.f32 1.442695, %v1813_v29 }
 0x742   : > { %5855 = vpow2.f32 %v1819_v30  ;;  %v1846_v34 = vpop.permute.xlu1 %1845  ;;  %v1809_v33 = vpop.xlane.xlu0 %1808 }
 0x743   : > { %5857 = vpow2.f32 %v1817_v31  ;;  %5335 = vmatprep.subr.mxu1 %v1846_v34  ;;  %v1815_v46 = vsub.f32 %v1792_v22, %v1809_v33 }
 0x744   : > { %5336 = vmatpush3.msra.mxu1 %v1846_v34 }
 0x745   : > { %v1821_v48 = vmul.f32 1.442695, %v1815_v46 }
 0x746   : > { %v1812_v44 = vpop.xlane.xlu0 %1811  ;;  %v2119_v59 = vpop.permute.xlu1 %2118 }
 0x747   : > { %v1816_v45 = vsub.f32 %v5334_v21, %v1812_v44 }
 0x749   : > { %v1823_v47 = vmul.f32 1.442695, %v1816_v45 }
 0x74a   : > { %v2115_v60 = vpop.permute.xlu1 %2114 }
 0x74b   : > { %5859 = vpow2.f32 %v1823_v47 }
 0x74c   : > { %v5856_v36 = vpop.eup %5855  ;;  %5861 = vpow2.f32 %v1821_v48 }
 0x74d   : > { %v5858_v37 = vpop.eup %5857  ;;  %v1828_v39 = vsel %vm670_vm1, %v5856_v36, 0.0 }
 0x74e   : > { %1829 = vadd.xlane.f32.xlu0 %v1828_v39  ;;  %v1825_v32 = vsel %vm670_vm1, %v5858_v37, 0.0 }
 0x74f   : > { %1826 = vadd.xlane.f32.xlu1 %v1825_v32 }
 0x755   : > { %v5860_v49 = vpop.eup %5859 }
 0x756   : > { %v5862_v51 = vpop.eup %5861  ;;  %v1834_v52 = vsel %vm670_vm1, %v5860_v49, 0.0 }
 0x757   : > { %v1831_v53 = vsel %vm670_vm1, %v5862_v51, 0.0 }
 0x760   : > { %2116 = vrot.lane.b32.xlu1 %v6576_v38, %s6210_s17 }
 0x764   : > { %1929 = vrot.lane.b32.xlu0 %v6602_v50, %s6209_s30 }
 0x783   : > { %1835 = vadd.xlane.f32.xlu0 %v1834_v52 }
 0x784   : > { %v6696_v54 = vpop.f32.mrb[6].mxu0  ;;  %1832 = vadd.xlane.f32.xlu1 %v1831_v53 }
 0x785   : > { %v6698_v38 = vpop.f32.mrb[7].mxu0 }
 0x788   : > { %v5293_v55 = vpop.f32.mrb[8].mxu0 }
 0x789   : > { %v1123_v56 = vpop.f32.mrb[9].mxu0  ;;  %v1222_v58 = vsel %vm670_vm1, %v5293_v55, -inf }
 0x78a   : > { %v1219_v57 = vsel %vm670_vm1, %v1123_v56, -inf }
 0x795   : > { %2201 = vrot.lane.b32.xlu1 %v6582_v40, %s6210_s17 }
 0x799   : > { %2205 = vrot.lane.b32.xlu0 %v6568_v35, %s6210_s17 }
 0x79d   : > { %2203 = vrot.lane.b32.xlu0 %v6590_v41, %s6210_s17 }
 0x7b9   : > { %1220 = vmax.xlane.f32.xlu1 %v1219_v57  ;;  %v391_v57 = vld [vmem:[#allocation7 + $0x68] sm:$0xff] }
 0x7bc   : > { %1223 = vmax.xlane.f32.xlu0 %v1222_v58  ;;  %v390_v58 = vld [vmem:[#allocation7 + $0x60] sm:$0xff] }
 0x7ca   : > { %1264 = vrot.lane.b32.xlu1 %v6613_v63, %s6208_s27 }
 0x7db   : > { %v1830_v61 = vpop.xlane.xlu0 %1829 }
 0x7dc   : > { %5863 = vrcp.f32 %v1830_v61  ;;  %v1827_v40 = vpop.xlane.xlu1 %1826 }
 0x7dd   : > { %5865 = vrcp.f32 %v1827_v40 }
 0x7df   : > { %v1930_v62 = vpop.permute.xlu0 %1929 }
 0x7e0   : > { %5340 = vmatprep.subr.mxu1 %v1930_v62  ;;  %v2117_v42 = vpop.permute.xlu1 %2116 }
 0x7e6   : > { %v5864_v35 = vpop.eup %5863 }
 0x7e7   : > { %v5866_v0 = vpop.eup %5865  ;;  %v1842_v1 = vmul.f32 %v5864_v35, %v5856_v36 }
 0x7e8   : > { %v1841_v41 = vmul.f32 %v5866_v0, %v5858_v37 }
 0x7ea   : > { %5337 = vmatprep.mubr.msk.f32.mxu1 %vm670_vm1, %v1841_v41 }
 0x7eb   : > { %5338 = vmatmul.mubr.msk.f32.vlgmr.msra.gmra.mrb[16].mxu1 %vm670_vm1, %v1842_v1 }
 0x7ec   : > { %5341 = vmatpush3.msra.mxu1 %v1930_v62 }
 0x7ed   : > { %5353 = vmatprep.subr.msk.mxu1 %vm670_vm1, %v2119_v59 }
 0x810   : > { %v1836_v43 = vpop.xlane.xlu0 %1835 }
 0x811   : > { %5867 = vrcp.f32 %v1836_v43  ;;  %v1833_v2 = vpop.xlane.xlu1 %1832 }
 0x812   : > { %5869 = vrcp.f32 %v1833_v2 }
 0x814   : > { %v2206_v12 = vpop.permute.xlu0 %2205 }
 0x815   : > { %v2202_v18 = vpop.permute.xlu1 %2201 }
 0x818   : > { %v2204_v19 = vpop.permute.xlu0 %2203 }
 0x81b   : > { %v5868_v5 = vpop.eup %5867 }
 0x81c   : > { %v5870_v6 = vpop.eup %5869  ;;  %v1844_v10 = vmul.f32 %v5868_v5, %v5860_v49 }
 0x81d   : > { %v1843_v7 = vmul.f32 %v5870_v6, %v5862_v51 }
 0x81f   : > { %5342 = vmatprep.mubr.msk.f32.mxu1 %vm670_vm1, %v1843_v7 }
 0x820   : > { %5343 = vmatmul.mubr.msk.f32.vlgmr.msra.gmra.mrb[18].mxu1 %vm670_vm1, %v1844_v10 }
 0x821   : > { %5354 = vmatpush3.xpose.msk.msra.mxu1 %vm670_vm1, %v2119_v59  ;;  %5355 = vmatprep.mubr.msk.f32.mxu1 %vm670_vm1, %v2115_v60 }
 0x822   : > { %5358 = vmatprep.subr.msk.mxu1 %vm670_vm1, %v2206_v12 }
 0x824   : > { %5356 = vmatmul.mubr.msk.f32.vlgmr.msra.gmra.mrb[20].mxu1 %vm670_vm1, %v2117_v42 }
 0x825   : > { %5359 = vmatpush3.xpose.msk.msra.mxu1 %vm670_vm1, %v2206_v12  ;;  %5360 = vmatprep.mubr.msk.f32.mxu1 %vm670_vm1, %v2202_v18 }
 0x828   : > { %5361 = vmatmul.mubr.msk.f32.vlgmr.msra.gmra.mrb[22].mxu1 %vm670_vm1, %v2204_v19 }
 0x846   : > { %v1221_v20 = vpop.xlane.xlu1 %1220 }
 0x847   : > { %v1231_v21 = vsub.f32 %v1123_v56, %v1221_v20 }
 0x849   : > { %v1235_v22 = vmul.f32 1.442695, %v1231_v21  ;;  %v1224_v23 = vpop.xlane.xlu0 %1223 }
 0x84a   : > { %v1232_v24 = vsub.f32 %v5293_v55, %v1224_v23  ;;  %v1265_v25 = vpop.permute.xlu1 %1264  ;;  %v392_v23 = vld [vmem:[#allocation7 + $0x70] sm:$0xff] }
 0x84b   : > { %5871 = vpow2.f32 %v1235_v22  ;;  %5299 = vmatprep.subr.mxu0 %v1265_v25 }
 0x84c   : > { %v1237_v26 = vmul.f32 1.442695, %v1232_v24  ;;  %5300 = vmatpush3.msra.mxu0 %v1265_v25 }
 0x84d   : > { %5309 = vmatprep.subr.mxu0 %v391_v57 }
 0x84e   : > { %5873 = vpow2.f32 %v1237_v26 }
 0x855   : > { %v5872_v27 = vpop.eup %5871 }
 0x856   : > { %v1243_v28 = vsel %vm670_vm1, %v5872_v27, 0.0 }
 0x857   : > { %1244 = vadd.xlane.f32.xlu0 %v1243_v28 }
 0x858   : > { %v5874_v29 = vpop.eup %5873 }
 0x859   : > { %v1246_v30 = vsel %vm670_vm1, %v5874_v29, 0.0 }
 0x85b   : > { %1247 = vadd.xlane.f32.xlu0 %v1246_v30  ;;  %v393_v30 = vld [vmem:[#allocation7 + $0x78] sm:$0xff] }
 0x8be   : > { %v6724_v31 = vpop.f32.mrb[16].mxu1 }
 0x8bf   : > { %v6726_v34 = vpop.f32.mrb[17].mxu1 }
 0x8e4   : > { %v1245_v36 = vpop.xlane.xlu0 %1244 }
 0x8e5   : > { %5875 = vrcp.f32 %v1245_v36 }
 0x8e8   : > { %v1248_v37 = vpop.xlane.xlu0 %1247 }
 0x8e9   : > { %5877 = vrcp.f32 %v1248_v37  ;;  %v2686_v37 = vld [vmem:[#allocation8] sm:$0xff] }
 0x8ef   : > { %v5876_v39 = vpop.eup %5875 }
 0x8f0   : > { %v1259_v32 = vmul.f32 %v5876_v39, %v5872_v27  ;;  %v2687_v39 = vld [vmem:[#allocation8 + $0x8] sm:$0xff] }
 0x8f2   : > { %5301 = vmatprep.mubr.msk.f32.mxu0 %vm670_vm1, %v1259_v32  ;;  %v5576_v32 = vpack.c.bf16 %v2687_v39, %v2686_v37 }
 0x8f3   : > { %v5878_v33 = vpop.eup %5877  ;;  %v6729_v44 = vpop.f32.mrb[18].mxu1 }
 0x8f4   : > { %v1260_v45 = vmul.f32 %v5878_v33, %v5874_v29  ;;  %v6731_v46 = vpop.f32.mrb[19].mxu1  ;;  %v2688_v33 = vld [vmem:[#allocation8 + $0x10] sm:$0xff] }
 0x8f6   : > { %5302 = vmatmul.mubr.msk.f32.vlgmr.msra.gmra.mrb[10].mxu0 %vm670_vm1, %v1260_v45 }
 0x8f7   : > { %v5357_v47 = vpop.f32.mrb[20].mxu1  ;;  %5310 = vmatpush3.msra.mxu0 %v391_v57  ;;  %v2699_v57 = vld [vmem:[#allocation8 + $0x58] sm:$0xff] }
 0x8f8   : > { %v2192_v48 = vpop.f32.mrb[21].mxu1  ;;  %v2291_v49 = vsel %vm670_vm1, %v5357_v47, -inf  ;;  %5317 = vmatprep.subr.mxu0 %v390_v58 }
 0x8f9   : > { %2292 = vmax.xlane.f32.xlu0 %v2291_v49  ;;  %v2288_v53 = vsel %vm670_vm1, %v2192_v48, -inf }
 0x8fb   : > { %v5362_v51 = vpop.f32.mrb[22].mxu1 }
 0x8fc   : > { %v2279_v52 = vpop.f32.mrb[23].mxu1  ;;  %v2297_v56 = vsel %vm670_vm1, %v5362_v51, -inf }
 0x8fd   : > { %2289 = vmax.xlane.f32.xlu0 %v2288_v53  ;;  %v2294_v55 = vsel %vm670_vm1, %v2279_v52, -inf  ;;  %v2697_v53 = vld [vmem:[#allocation8 + $0x48] sm:$0xff] }
 0x901   : > { %2295 = vmax.xlane.f32.xlu0 %v2294_v55 }
 0x905   : > { %2298 = vmax.xlane.f32.xlu0 %v2297_v56  ;;  %v2698_v56 = vld [vmem:[#allocation8 + $0x50] sm:$0xff] }
 0x986   : > { %v2293_v59 = vpop.xlane.xlu0 %2292 }
 0x987   : > { %v2301_v60 = vsub.f32 %v5357_v47, %v2293_v59 }
 0x989   : > { %v2306_v61 = vmul.f32 1.442695, %v2301_v60 }
 0x98a   : > { %v2290_v40 = vpop.xlane.xlu0 %2289 }
 0x98b   : > { %5879 = vpow2.f32 %v2306_v61  ;;  %v2300_v62 = vsub.f32 %v2192_v48, %v2290_v40  ;;  %v6213_v61 = vmov 0.0  }
 0x98d   : > { %v2304_v35 = vmul.f32 1.442695, %v2300_v62 }
 0x98e   : > { %v2296_v0 = vpop.xlane.xlu0 %2295 }
 0x98f   : > { %5881 = vpow2.f32 %v2304_v35  ;;  %v2302_v41 = vsub.f32 %v2279_v52, %v2296_v0 }
 0x991   : > { %v2308_v2 = vmul.f32 1.442695, %v2302_v41  ;;  %v4995_v41 = vld [vmem:[#allocation10 + $0x9] ss:$0 sm:$0xff] }
 0x992   : > { %v2299_v1 = vpop.xlane.xlu0 %2298 }
 0x993   : > { %v2303_v42 = vsub.f32 %v5362_v51, %v2299_v1 }
 0x995   : > { %v5880_v43 = vpop.eup %5879  ;;  %v2310_v5 = vmul.f32 1.442695, %v2303_v42 }
 0x996   : > { %v2315_v6 = vsel %vm670_vm1, %v5880_v43, 0.0 }
 0x997   : > { %5883 = vpow2.f32 %v2310_v5  ;;  %2316 = vadd.xlane.f32.xlu0 %v2315_v6  ;;  %v4992_v5 = vld [vmem:[#allocation10 + $0x8] ss:$0 sm:$0xff] }
 0x998   : > { %5885 = vpow2.f32 %v2308_v2 }
 0x999   : > { %v5882_v7 = vpop.eup %5881 }
 0x99a   : > { %v2312_v10 = vsel %vm670_vm1, %v5882_v7, 0.0 }
 0x99b   : > { %2313 = vadd.xlane.f32.xlu1 %v2312_v10 }
 0x9a1   : > { %v5884_v12 = vpop.eup %5883 }
 0x9a2   : > { %v2321_v18 = vsel %vm670_vm1, %v5884_v12, 0.0  ;;  %v5886_v19 = vpop.eup %5885 }
 0x9a3   : > { %2322 = vadd.xlane.f32.xlu0 %v2321_v18  ;;  %v2318_v20 = vsel %vm670_vm1, %v5886_v19, 0.0 }
 0x9a7   : > { %2319 = vadd.xlane.f32.xlu0 %v2318_v20 }
 0x9ac   : > { %2416 = vrot.lane.b32.xlu1 %v6602_v50, %s6210_s17 }
 0x9bd   : > { %2332 = vrot.lane.b32.xlu0 %v6613_v63, %s6210_s17 }
 0x9c9   : > { %v5303_v21 = vpop.f32.mrb[10].mxu0 }
 0x9ca   : > { %v1339_v22 = vpop.f32.mrb[11].mxu0 }
 0x9cb   : > { %5311 = vmatprep.mubr.msk.f32.mxu0 %vm670_vm1, %v1339_v22 }
 0x9cc   : > { %5312 = vmatmul.mubr.msk.f32.vlgmr.msra.gmra.mrb[12].mxu0 %vm670_vm1, %v5303_v21 }
 0x9cd   : > { %5314 = vmatprep.mubr.msk.f32.mxu0 %vm670_vm1, %v6671_v4  ;;  %5318 = vmatpush3.msra.mxu0 %v390_v58  ;;  %v5596_v58 = vpack.c.bf16 %v2699_v57, %v2698_v56 }
 0x9ce   : > { %5345 = vmatprep.subr.mxu0 %v392_v23 }
 0x9d0   : > { %5315 = vmatmul.mubr.msk.f32.gmra.mrb[14].mxu0 %vm670_vm1, %v6669_v3 }
 0x9d1   : > { %5319 = vmatprep.mubr.msk.f32.mxu0 %vm670_vm1, %v6698_v38 }
 0x9d4   : > { %5320 = vmatmul.mubr.msk.f32.vlgmr.msra.gmra.mrb[12].mxu0 %vm670_vm1, %v6696_v54 }
 0x9d5   : > { %5322 = vmatprep.mubr.msk.f32.mxu0 %vm670_vm1, %v6624_v9  ;;  %5346 = vmatpush3.msra.mxu0 %v392_v23 }
 0x9d8   : > { %5323 = vmatmul.mubr.msk.f32.gmra.mrb[14].mxu0 %vm670_vm1, %v6622_v8 }
 0x9d9   : > { %5347 = vmatprep.mubr.msk.f32.mxu0 %vm670_vm1, %v6726_v34  ;;  %v2692_v34 = vld [vmem:[#allocation8 + $0x28] sm:$0xff] }
 0x9dc   : > { %5348 = vmatmul.mubr.msk.f32.vlgmr.msra.gmra.mrb[12].mxu0 %vm670_vm1, %v6724_v31  ;;  %v2691_v31 = vld [vmem:[#allocation8 + $0x20] sm:$0xff] }
 0x9dd   : > { %5350 = vmatprep.mubr.msk.f32.mxu0 %vm670_vm1, %v6731_v46  ;;  %v5584_v36 = vpack.c.bf16 %v2692_v34, %v2691_v31  ;;  %v2694_v46 = vld [vmem:[#allocation8 + $0x38] sm:$0xff] }
 0x9e0   : > { %5351 = vmatmul.mubr.msk.f32.gmra.mrb[14].mxu0 %vm670_vm1, %v6729_v44  ;;  %v2689_v44 = vld [vmem:[#allocation8 + $0x18] sm:$0xff] }
 0x9e1   : > { %v5580_v45 = vpack.c.bf16 %v2689_v44, %v2688_v33 }
 0xa24   : > { %v2317_v63 = vpop.xlane.xlu0 %2316 }
 0xa28   : > { %v2314_v50 = vpop.xlane.xlu1 %2313 }
 0xa29   : > { %5887 = vrcp.f32 %v2314_v50 }
 0xa2a   : > { %5889 = vrcp.f32 %v2317_v63 }
 0xa2c   : > { %v2417_v9 = vpop.permute.xlu1 %2416 }
 0xa2d   : > { %5368 = vmatprep.subr.mxu1 %v2417_v9 }
 0xa2e   : > { %5369 = vmatpush3.msra.mxu1 %v2417_v9 }
 0xa2f   : > { %5577 = vmatprep.subr.bf16.mxu1 %v5576_v32 }
 0xa30   : > { %v2323_v8 = vpop.xlane.xlu0 %2322 }
 0xa31   : > { %5891 = vrcp.f32 %v2323_v8 }
 0xa33   : > { %v5888_v3 = vpop.eup %5887 }
 0xa34   : > { %v2320_v4 = vpop.xlane.xlu0 %2319  ;;  %v2328_v54 = vmul.f32 %v5888_v3, %v5882_v7  ;;  %v5890_v38 = vpop.eup %5889 }
 0xa35   : > { %5893 = vrcp.f32 %v2320_v4  ;;  %v2329_v25 = vmul.f32 %v5890_v38, %v5880_v43  ;;  %v5000_v4 = vld [vmem:[#allocation10 + $0xa] ss:$0 sm:$0xff] }
 0xa36   : > { %5365 = vmatprep.mubr.msk.f32.mxu0 %vm670_vm1, %v2328_v54 }
 0xa38   : > { %v2333_v24 = vpop.permute.xlu0 %2332 }
 0xa39   : > { %5363 = vmatprep.subr.mxu0 %v2333_v24 }
 0xa3a   : > { %5364 = vmatpush3.msra.mxu0 %v2333_v24 }
 0xa3b   : > { %5366 = vmatmul.mubr.msk.f32.vlgmr.msra.gmra.mrb[16].mxu0 %vm670_vm1, %v2329_v25  ;;  %v5892_v26 = vpop.eup %5891  ;;  %5373 = vmatprep.subr.mxu0 %v393_v30 }
 0xa3c   : > { %v2331_v29 = vmul.f32 %v5892_v26, %v5884_v12  ;;  %5374 = vmatpush3.msra.mxu0 %v393_v30 }
 0xa3d   : > { %5585 = vmatprep.subr.bf16.mxu0 %v5584_v36 }
 0xa3f   : > { %v5894_v27 = vpop.eup %5893 }
 0xa40   : > { %v2330_v28 = vmul.f32 %v5894_v27, %v5886_v19 }
 0xa42   : > { %5370 = vmatprep.mubr.msk.f32.mxu1 %vm670_vm1, %v2330_v28 }
 0xa43   : > { %5371 = vmatmul.mubr.msk.f32.vlgmr.msra.gmra.mrb[24].mxu1 %vm670_vm1, %v2331_v29 }
 0xa44   : > { %5389 = vmatprep.mubr.msk.f32.mxu1 %vm404_vm0, %v6538_v13  ;;  %5579 = vmatpush3.bf16.msra.mxu1 %v5576_v32  ;;  %v2693_v13 = vld [vmem:[#allocation8 + $0x30] sm:$0xff] }
 0xa45   : > { %5581 = vmatprep.subr.bf16.mxu1 %v5580_v45  ;;  %v5588_v49 = vpack.c.bf16 %v2694_v46, %v2693_v13 }
 0xa48   : > { %5583 = vmatpush3.bf16.msra.mxu1 %v5580_v45 }
 0xa4b   : > { %5390 = vmatmul.mubr.msk.f32.vlgmr.msra.gmra.mrb[26].mxu1 %vm404_vm0, %v6546_v15  ;;  %v2696_v15 = vld [vmem:[#allocation8 + $0x40] sm:$0xff] }
 0xa4c   : > { %5414 = vmatprep.mubr.msk.f32.mxu1 %vm404_vm0, %v6533_v11  ;;  %v5592_v55 = vpack.c.bf16 %v2697_v53, %v2696_v15 }
 0xa4e   : > { %5593 = vmatprep.subr.bf16.mxu1 %v5592_v55 }
 0xa4f   : > { %5595 = vmatpush3.bf16.msra.mxu1 %v5592_v55 }
 0xa50   : > { %5597 = vmatprep.subr.bf16.mxu1 %v5596_v58 }
 0xa53   : > { %5599 = vmatpush3.bf16.msra.mxu1 %v5596_v58 }
 0xa56   : > { %5415 = vmatmul.mubr.msk.f32.vlgmr.msra.gmra.mrb[28].mxu1 %vm404_vm0, %v6543_v14 }
 0xa57   : > { %5417 = vmatprep.mubr.msk.f32.mxu1 %vm404_vm0, %v6549_v16 }
 0xa5a   : > { %5418 = vmatmul.mubr.msk.f32.gmra.mrb[30].mxu1 %vm404_vm0, %v6558_v17 }
 0xa5b   : > { %5431 = vmatprep.mubr.msk.f32.mxu1 %vm6212_vm2, %v6213_v61 }
 0xb0e   : > { %v5367_v47 = vpop.f32.mrb[16].mxu0 }
 0xb0f   : > { %v2407_v48 = vpop.f32.mrb[17].mxu0 }
 0xb10   : > { %5375 = vmatprep.mubr.msk.f32.mxu0 %vm670_vm1, %v2407_v48 }
 0xb11   : > { %5376 = vmatmul.mubr.msk.f32.vlgmr.msra.gmra.mrb[12].mxu0 %vm670_vm1, %v5367_v47 }
 0xb12   : > { %5587 = vmatpush3.bf16.msra.mxu0 %v5584_v36 }
 0xb13   : > { %5589 = vmatprep.subr.bf16.mxu0 %v5588_v49 }
 0xb16   : > { %v5372_v51 = vpop.f32.mrb[24].mxu1  ;;  %5591 = vmatpush3.bf16.msra.mxu0 %v5588_v49 }
 0xb17   : > { %v2491_v52 = vpop.f32.mrb[25].mxu1 }
 0xb18   : > { %5378 = vmatprep.mubr.msk.f32.mxu0 %vm670_vm1, %v2491_v52 }
 0xb19   : > { %5379 = vmatmul.mubr.msk.f32.gmra.mrb[14].mxu0 %vm670_vm1, %v5372_v51 }
 0xb1a   : > { %5400 = vmatprep.mubr.msk.f32.mxu0 %vm404_vm0, %v6533_v11  ;;  %v6211_v11 = vmov 0.0|0.0  }
 0xb1b   : > { %5600 = vmatprep.subr.bf16.mxu0 %v6211_v11  ;;  %5604 = vmatprep.subr.bf16.mxu1 %v6211_v11 }
 0xb1d   : > { %5401 = vmatmul.mubr.msk.f32.vlgmr.msra.gmra.mrb[18].mxu0 %vm404_vm0, %v6543_v14  ;;  %v6802_v14 = vld [vmem:[#allocation10 + $0x3] ss:$0 sm:$0xff] }
 0xb1e   : > { %5403 = vmatprep.mubr.msk.f32.mxu0 %vm404_vm0, %v6549_v16  ;;  %v5391_v59 = vpop.f32.mrb[26].mxu1 }
 0xb1f   : > { %v2781_v60 = vpop.f32.mrb[27].mxu1  ;;  %v2787_v63 = vadd.f32 %v5391_v59, %v4992_v5 }
 0xb20   : > { %v2782_v20 = vadd.f32 %v4992_v5, %v2781_v60 }
 0xb21   : > { %5404 = vmatmul.mubr.msk.f32.gmra.mrb[20].mxu0 %vm404_vm0, %v6558_v17  ;;  %v6836_v9 = vmul.f32 0.35355338, %v2787_v63 }
 0xb22   : > { %5424 = vmatprep.mubr.msk.f32.mxu0 %vm6212_vm2, %v6213_v61  ;;  %v6827_v50 = vmul.f32 0.35355338, %v2782_v20 }
 0xb29   : > { %v5416_v8 = vpop.f32.mrb[28].mxu1 }
 0xb2a   : > { %v2949_v3 = vpop.f32.mrb[29].mxu1  ;;  %v2955_v26 = vadd.f32 %v5416_v8, %v5000_v4 }
 0xb2b   : > { %v2950_v27 = vadd.f32 %v5000_v4, %v2949_v3 }
 0xb2d   : > { %v5419_v54 = vpop.f32.mrb[30].mxu1  ;;  %v5609_v28 = vpack.c.bf16 %v2955_v26, %v2950_v27  ;;  %v6843_v29 = vpack.i.bf16 %v2955_v26, %v2950_v27 }
 0xb2e   : > { %v2965_v38 = vadd.f32 %v5419_v54, %v5000_v4  ;;  %v2959_v24 = vpop.f32.mrb[31].mxu1 }
 0xb2f   : > { %v2960_v25 = vadd.f32 %v5000_v4, %v2959_v24 }
 0xb31   : > { %v5612_v30 = vpack.c.bf16 %v2965_v38, %v2960_v25  ;;  %v6845_v31 = vpack.i.bf16 %v2965_v38, %v2960_v25 }
 0xbe4   : > { %v5377_v40 = vpop.f32.mrb[12].mxu0 }
 0xbe5   : > { %v6805_v62 = vadd.f32 %v5377_v40, %v6802_v14  ;;  %v6807_v35 = vpop.f32.mrb[13].mxu0 }
 0xbec   : > { %v5380_v16 = vpop.f32.mrb[14].mxu0 }
 0xbed   : > { %v6810_v0 = vadd.f32 %v5380_v16, %v6802_v14  ;;  %v6812_v17 = vpop.f32.mrb[15].mxu0 }
 0xbf0   : > { %v5402_v1 = vpop.f32.mrb[18].mxu0 }
 0xbf1   : > { %v2866_v42 = vadd.f32 %v5402_v1, %v4995_v41  ;;  %v2860_v43 = vpop.f32.mrb[19].mxu0 }
 0xbf2   : > { %v2861_v2 = vadd.f32 %v4995_v41, %v2860_v43 }
 0xbf4   : > { %v5601_v7 = vpack.c.bf16 %v2866_v42, %v2861_v2  ;;  %v5405_v10 = vpop.f32.mrb[20].mxu0  ;;  %v6820_v12 = vpack.i.bf16 %v2866_v42, %v2861_v2 }
 0xbf5   : > { %v2876_v18 = vadd.f32 %v5405_v10, %v4995_v41  ;;  %v2870_v19 = vpop.f32.mrb[21].mxu0 }
 0xbf6   : > { %v2871_v21 = vadd.f32 %v4995_v41, %v2870_v19  ;;  %5603 = vmatpush3.bf16.xpose.msk.msra.mxu0 %vm6816_vm3, %v5601_v7 }
 0xbf7   : > { %5608 = vmatprep.subr.bf16.mxu0 %v6211_v11 }
 0xbf8   : > { %v5605_v22 = vpack.c.bf16 %v2876_v18, %v2871_v21  ;;  %v6825_v23 = vpack.i.bf16 %v2876_v18, %v2871_v21 }
 0xbfa   : > { %5607 = vmatpush3.bf16.xpose.msk.msra.mxu1 %vm6816_vm3, %v5605_v22 }
 0xbfb   : > { %5614 = vmatprep.subr.bf16.mxu1 %v6211_v11 }
 0xbfd   : > { %5425 = vmatmul.mubr.msk.f32.vlgmr.msra.gmra.mrb[22].mxu0 %vm670_vm1, %v6827_v50 }
 0xbfe   : > { %5438 = vmatprep.mubr.msk.f32.mxu0 %vm6212_vm2, %v6213_v61  ;;  %5610 = vmatpush3.bf16.msra.mxu0 %v5609_v28 }
 0xbff   : > { %5611 = vmatprep.subr.bf16.mxu0 %v6211_v11 }
 0xc01   : > { %5432 = vmatmul.mubr.msk.f32.vlgmr.msra.gmra.mrb[32].mxu1 %vm670_vm1, %v6836_v9 }
 0xc02   : > { %5452 = vmatprep.mubr.msk.f32.mxu1 %vm6212_vm2, %v6213_v61 }
 0xcd0   : > { %v3045_v34 = vpop.f32.mrb[22].mxu0 }
 0xcd1   : > { %v3129_v36 = vsel %vm3128_vm4, %v3045_v34, -inf  ;;  %v5426_v37 = vpop.f32.mrb[23].mxu0 }
 0xcd2   : > { %3130 = vmax.xlane.f32.xlu0 %v3129_v36 }
 0xcd4   : > { %v3124_v39 = vpop.f32.mrb[32].mxu1 }
 0xcd5   : > { %v5433_v32 = vpop.f32.mrb[33].mxu1  ;;  %v3132_v33 = vsel %vm3128_vm4, %v3124_v39, -inf }
 0xcd6   : > { %3133 = vmax.xlane.f32.xlu1 %v3132_v33 }
 0xce7   : > { %5777 = vrot.lane.b32.xlu1 %v6825_v23, %s6208_s27 }
 0xd5f   : > { %v3131_v44 = vpop.xlane.xlu0 %3130 }
 0xd60   : > { %v3135_v45 = vsub.f32 %v3045_v34, %v3131_v44 }
 0xd62   : > { %v3137_v13 = vmul.f32 1.442695, %v3135_v45 }
 0xd63   : > { %v3134_v48 = vpop.xlane.xlu1 %3133 }
 0xd64   : > { %5895 = vpow2.f32 %v3137_v13  ;;  %v3136_v49 = vsub.f32 %v3124_v39, %v3134_v48 }
 0xd66   : > { %v3139_v51 = vmul.f32 1.442695, %v3136_v49 }
 0xd67   : > { %v5778_v41 = vpop.permute.xlu1 %5777 }
 0xd68   : > { %5897 = vpow2.f32 %v3139_v51  ;;  %v5780_v1 = vunpack.i.h.bf16 %v5778_v41  ;;  %v5779_v42 = vunpack.i.l.bf16 %v5778_v41 }
 0xd6a   : > { %v5619_v5 = vpack.c.bf16 %v5780_v1, %v5779_v42 }
 0xd6e   : > { %v5896_v46 = vpop.eup %5895 }
 0xd6f   : > { %v3141_v47 = vsel %vm3128_vm4, %v5896_v46, 0.0 }
 0xd70   : > { %3142 = vadd.xlane.f32.xlu0 %v3141_v47 }
 0xd72   : > { %v5898_v52 = vpop.eup %5897 }
 0xd73   : > { %v3144_v15 = vsel %vm3128_vm4, %v5898_v52, 0.0 }
 0xd86   : > { %5772 = vrot.lane.b32.xlu0 %v6820_v12, %s6208_s27 }
 0xda5   : > { %3145 = vadd.xlane.f32.xlu0 %v3144_v15 }
 0xdbb   : > { %3297 = vrot.lane.b32.xlu0 %v6827_v50, %s6208_s27 }
 0xdbf   : > { %3379 = vrot.lane.b32.xlu0 %v6836_v9, %s6208_s27 }
 0xdfd   : > { %v3143_v53 = vpop.xlane.xlu0 %3142 }
 0xdfe   : > { %5899 = vrcp.f32 %v3143_v53 }
 0xe01   : > { %v5773_v55 = vpop.permute.xlu0 %5772 }
 0xe02   : > { %v5775_v56 = vunpack.i.h.bf16 %v5773_v55  ;;  %v5774_v57 = vunpack.i.l.bf16 %v5773_v55 }
 0xe04   : > { %v5615_v58 = vpack.c.bf16 %v5775_v56, %v5774_v57 }
 0xe06   : > { %5617 = vmatpush3.bf16.xpose.msk.msra.mxu1 %vm6816_vm3, %v5615_v58 }
 0xe07   : > { %5622 = vmatprep.subr.bf16.mxu1 %v6211_v11 }
 0xe08   : > { %v5900_v59 = vpop.eup %5899 }
 0xe09   : > { %v3149_v60 = vmul.f32 %v5900_v59, %v5896_v46  ;;  %v2702_v59 = vld [vmem:[#allocation8 + $0x68] sm:$0xff] }
 0xe0b   : > { %5439 = vmatmul.mubr.msk.f32.vlgmr.msra.gmra.mrb[24].mxu0 %vm3128_vm4, %v3149_v60  ;;  %v2701_v60 = vld [vmem:[#allocation8 + $0x60] sm:$0xff] }
 0xe0c   : > { %5613 = vmatpush3.bf16.msra.mxu0 %v5612_v30  ;;  %5445 = vmatprep.mubr.msk.f32.mxu0 %vm6212_vm2, %v6213_v61 }
 0xe0d   : > { %5618 = vmatprep.subr.bf16.mxu0 %v6211_v11 }
 0xe32   : > { %v3146_v40 = vpop.xlane.xlu0 %3145 }
 0xe33   : > { %5901 = vrcp.f32 %v3146_v40 }
 0xe36   : > { %v3298_v16 = vpop.permute.xlu0 %3297 }
 0xe37   : > { %5453 = vmatmul.mubr.msk.f32.vlgmr.msra.gmra.mrb[34].mxu1 %vm670_vm1, %v3298_v16 }
 0xe38   : > { %5466 = vmatprep.mubr.msk.f32.mxu1 %vm6212_vm2, %v6213_v61 }
 0xe3a   : > { %v3380_v7 = vpop.permute.xlu0 %3379 }
 0xe3d   : > { %v5902_v43 = vpop.eup %5901 }
 0xe3e   : > { %v3150_v2 = vmul.f32 %v5902_v43, %v5898_v52 }
 0xe40   : > { %5446 = vmatmul.mubr.msk.f32.vlgmr.msra.gmra.mrb[26].mxu0 %vm3128_vm4, %v3150_v2 }
 0xe41   : > { %5621 = vmatpush3.bf16.xpose.msk.msra.mxu0 %vm6816_vm3, %v5619_v5  ;;  %5459 = vmatprep.mubr.msk.f32.mxu0 %vm6212_vm2, %v6213_v61 }
 0xe42   : > { %5625 = vmatprep.subr.bf16.mxu0 %v6211_v11 }
 0xe48   : > { %5460 = vmatmul.mubr.msk.f32.vlgmr.msra.gmra.mrb[28].mxu0 %vm670_vm1, %v3380_v7 }
 0xe49   : > { %5473 = vmatprep.mubr.msk.f32.mxu0 %vm6212_vm2, %v6213_v61 }
 0xede   : > { %v6878_v10 = vpop.f32.mrb[24].mxu0 }
 0xedf   : > { %v5440_v18 = vpop.f32.mrb[25].mxu0 }
 0xf0a   : > { %v3375_v19 = vpop.f32.mrb[34].mxu1 }
 0xf0b   : > { %v5454_v20 = vpop.f32.mrb[35].mxu1  ;;  %v3461_v21 = vsel %vm3128_vm4, %v3375_v19, -inf }
 0xf0c   : > { %3462 = vmax.xlane.f32.xlu0 %v3461_v21 }
 0xf13   : > { %v6881_v22 = vpop.f32.mrb[26].mxu0 }
 0xf14   : > { %v5447_v63 = vpop.f32.mrb[27].mxu0 }
 0xf1b   : > { %v3457_v8 = vpop.f32.mrb[28].mxu0 }
 0xf1c   : > { %v5461_v3 = vpop.f32.mrb[29].mxu0  ;;  %v3464_v4 = vsel %vm3128_vm4, %v3457_v8, -inf }
 0xf1d   : > { %3465 = vmax.xlane.f32.xlu1 %v3464_v4 }
 0xf2e   : > { %5782 = vrot.lane.b32.xlu1 %v6843_v29, %s6208_s27 }
 0xf32   : > { %5792 = vrot.lane.b32.xlu1 %v6820_v12, %s6209_s30 }
 0xf36   : > { %5797 = vrot.lane.b32.xlu1 %v6825_v23, %s6209_s30 }
 0xf3a   : > { %3889 = vrot.lane.b32.xlu1 %v6836_v9, %s6209_s30 }
 0xf99   : > { %v3463_v54 = vpop.xlane.xlu0 %3462 }
 0xf9a   : > { %v3467_v38 = vsub.f32 %v3375_v19, %v3463_v54 }
 0xf9c   : > { %v3469_v24 = vmul.f32 1.442695, %v3467_v38 }
 0xf9e   : > { %5903 = vpow2.f32 %v3469_v24 }
 0xfa8   : > { %v5904_v25 = vpop.eup %5903 }
 0xfa9   : > { %v3473_v26 = vsel %vm3128_vm4, %v5904_v25, 0.0 }
 0xfaa   : > { %v3466_v27 = vpop.xlane.xlu1 %3465  ;;  %3474 = vadd.xlane.f32.xlu0 %v3473_v26 }
 0xfab   : > { %v3468_v28 = vsub.f32 %v3457_v8, %v3466_v27 }
 0xfad   : > { %v3471_v30 = vmul.f32 1.442695, %v3468_v28 }
 0xfae   : > { %v5783_v34 = vpop.permute.xlu1 %5782 }
 0xfaf   : > { %5905 = vpow2.f32 %v3471_v30  ;;  %v5785_v36 = vunpack.i.h.bf16 %v5783_v34  ;;  %v5784_v37 = vunpack.i.l.bf16 %v5783_v34 }
 0xfb1   : > { %v5623_v39 = vpack.c.bf16 %v5785_v36, %v5784_v37 }
 0xfb2   : > { %v5793_v52 = vpop.permute.xlu1 %5792 }
 0xfb3   : > { %5624 = vmatpush3.bf16.msra.mxu1 %v5623_v39  ;;  %v5795_v53 = vunpack.i.h.bf16 %v5793_v52  ;;  %v5794_v55 = vunpack.i.l.bf16 %v5793_v52 }
 0xfb4   : > { %5476 = vmatprep.subr.mxu1 %v2702_v59 }
 0xfb5   : > { %v5629_v57 = vpack.c.bf16 %v5795_v53, %v5794_v55 }
 0xfb6   : > { %v5798_v1 = vpop.permute.xlu1 %5797 }
 0xfb7   : > { %v5800_v43 = vunpack.i.h.bf16 %v5798_v1  ;;  %v5799_v2 = vunpack.i.l.bf16 %v5798_v1 }
 0xfb9   : > { %v5906_v32 = vpop.eup %5905  ;;  %v5633_v5 = vpack.c.bf16 %v5800_v43, %v5799_v2 }
 0xfba   : > { %v3476_v33 = vsel %vm3128_vm4, %v5906_v32, 0.0 }
 0xfbb   : > { %3477 = vadd.xlane.f32.xlu0 %v3476_v33 }
 0xfd1   : > { %5787 = vrot.lane.b32.xlu0 %v6845_v31, %s6208_s27 }
 0xfd5   : > { %3807 = vrot.lane.b32.xlu0 %v6827_v50, %s6209_s30 }
0x1037   : > { %v3475_v44 = vpop.xlane.xlu0 %3474 }
0x1038   : > { %5907 = vrcp.f32 %v3475_v44 }
0x1042   : > { %v5908_v45 = vpop.eup %5907 }
0x1043   : > { %v3481_v13 = vmul.f32 %v5908_v45, %v5904_v25 }
0x1045   : > { %5467 = vmatmul.mubr.msk.f32.vlgmr.msra.gmra.mrb[36].mxu1 %vm3128_vm4, %v3481_v13 }
0x1046   : > { %5477 = vmatpush3.msra.mxu1 %v2702_v59 }
0x1047   : > { %5481 = vmatprep.subr.mxu1 %v2701_v60 }
0x1048   : > { %v3478_v46 = vpop.xlane.xlu0 %3477 }
0x1049   : > { %5909 = vrcp.f32 %v3478_v46 }
0x104c   : > { %v5788_v47 = vpop.permute.xlu0 %5787 }
0x104d   : > { %v5790_v48 = vunpack.i.h.bf16 %v5788_v47  ;;  %v5789_v49 = vunpack.i.l.bf16 %v5788_v47 }
0x104f   : > { %v5626_v51 = vpack.c.bf16 %v5790_v48, %v5789_v49 }
0x1050   : > { %v3808_v58 = vpop.permute.xlu0 %3807 }
0x1051   : > { %5627 = vmatpush3.bf16.msra.mxu0 %v5626_v51 }
0x1052   : > { %5628 = vmatprep.subr.bf16.mxu0 %v6211_v11 }
0x1053   : > { %v5910_v15 = vpop.eup %5909 }
0x1054   : > { %v3482_v56 = vmul.f32 %v5910_v15, %v5906_v32 }
0x1056   : > { %5474 = vmatmul.mubr.msk.f32.vlgmr.msra.gmra.mrb[30].mxu0 %vm3128_vm4, %v3482_v56 }
0x1057   : > { %5490 = vmatprep.mubr.msk.f32.mxu0 %vm6212_vm2, %v6213_v61 }
0x105a   : > { %5631 = vmatpush3.bf16.xpose.msk.msra.mxu0 %vm6816_vm3, %v5629_v57 }
0x105b   : > { %5636 = vmatprep.subr.bf16.mxu0 %v6211_v11 }
0x1061   : > { %5491 = vmatmul.mubr.msk.f32.vlgmr.msra.gmra.mrb[32].mxu0 %vm670_vm1, %v3808_v58 }
0x1062   : > { %5504 = vmatprep.mubr.msk.f32.mxu0 %vm6212_vm2, %v6213_v61 }
0x1118   : > { %v3560_v40 = vpop.f32.mrb[36].mxu1 }
0x1119   : > { %v5468_v16 = vpop.f32.mrb[37].mxu1  ;;  %5478 = vmatprep.mubr.msk.f32.mxu1 %vm670_vm1, %v3560_v40 }
0x1129   : > { %v3641_v41 = vpop.f32.mrb[30].mxu0 }
0x112a   : > { %v5475_v42 = vpop.f32.mrb[31].mxu0  ;;  %5479 = vmatmul.mubr.msk.f32.vlgmr.msra.gmra.mrb[38].mxu1 %vm670_vm1, %v3641_v41 }
0x112b   : > { %5482 = vmatpush3.msra.mxu1 %v2701_v60  ;;  %5483 = vmatprep.mubr.msk.f32.mxu1 %vm670_vm1, %v6878_v10  ;;  %v3890_v10 = vpop.permute.xlu1 %3889 }
0x112c   : > { %5632 = vmatprep.subr.bf16.mxu1 %v6211_v11 }
0x1132   : > { %5484 = vmatmul.mubr.msk.f32.vlgmr.msra.gmra.mrb[38].mxu1 %vm670_vm1, %v6881_v22 }
0x1133   : > { %5635 = vmatpush3.bf16.xpose.msk.msra.mxu1 %vm6816_vm3, %v5633_v5  ;;  %5497 = vmatprep.mubr.msk.f32.mxu1 %vm6212_vm2, %v6213_v61 }
0x1134   : > { %v3885_v7 = vpop.f32.mrb[32].mxu0 }
0x1135   : > { %v5492_v18 = vpop.f32.mrb[33].mxu0  ;;  %v3971_v19 = vsel %vm3128_vm4, %v3885_v7, -inf }
0x1136   : > { %3972 = vmax.xlane.f32.xlu0 %v3971_v19  ;;  %v2607_v18 = vadd.f32 %v6802_v14, %v6812_v17  ;;  %v5939_v19 = vld [vmem:[%s6508_s11] sm:$0xff] }
0x113a   : > { %5498 = vmatmul.mubr.msk.f32.vlgmr.msra.gmra.mrb[40].mxu1 %vm670_vm1, %v3890_v10 }
0x11c3   : > { %v3973_v20 = vpop.xlane.xlu0 %3972 }
0x11c4   : > { %v3977_v21 = vsub.f32 %v3885_v7, %v3973_v20 }
0x11c6   : > { %v3979_v63 = vmul.f32 1.442695, %v3977_v21  ;;  %v5940_v21 = vld [vmem:[%s6508_s11 + $0x10] sm:$0xff] }
0x11c8   : > { %5911 = vpow2.f32 %v3979_v63  ;;  %v6977_v63 = vadd.f32 %v5940_v21, %v2607_v18 }
0x11d2   : > { %v5912_v8 = vpop.eup %5911 }
0x11d3   : > { %v3983_v22 = vsel %vm3128_vm4, %v5912_v8, 0.0 }
0x11d4   : > { %3984 = vadd.xlane.f32.xlu0 %v3983_v22 }
0x120d   : > { %v3967_v3 = vpop.f32.mrb[40].mxu1 }
0x120e   : > { %v5499_v4 = vpop.f32.mrb[41].mxu1  ;;  %v3974_v54 = vsel %vm3128_vm4, %v3967_v3, -inf }
0x120f   : > { %3975 = vmax.xlane.f32.xlu1 %v3974_v54 }
0x1220   : > { %5802 = vrot.lane.b32.xlu1 %v6843_v29, %s6209_s30 }
0x1224   : > { %5812 = vrot.lane.b32.xlu1 %v6820_v12, %s6210_s17 }
0x1228   : > { %5817 = vrot.lane.b32.xlu1 %v6825_v23, %s6210_s17 }
0x122c   : > { %4316 = vrot.lane.b32.xlu1 %v6836_v9, %s6210_s17  ;;  %v2703_v9 = vld [vmem:[#allocation8 + $0x70] sm:$0xff] }
0x122d   : > { %5514 = vmatprep.subr.mxu1 %v2703_v9 }
0x122e   : > { %5515 = vmatpush3.msra.mxu1 %v2703_v9 }
0x122f   : > { %5646 = vmatprep.subr.bf16.mxu1 %v6211_v11 }
0x1261   : > { %v3985_v38 = vpop.xlane.xlu0 %3984 }
0x1262   : > { %5913 = vrcp.f32 %v3985_v38 }
0x126c   : > { %v5914_v34 = vpop.eup %5913 }
0x126d   : > { %v3991_v37 = vmul.f32 %v5914_v34, %v5912_v8  ;;  %v2619_v8 = vsel %vm404_vm0, %v6977_v63, 0.0 }
0x129c   : > { %v3976_v24 = vpop.xlane.xlu1 %3975 }
0x129d   : > { %v3978_v25 = vsub.f32 %v3967_v3, %v3976_v24 }
0x129f   : > { %v3981_v26 = vmul.f32 1.442695, %v3978_v25 }
0x12a0   : > { %v5803_v27 = vpop.permute.xlu1 %5802 }
0x12a1   : > { %5915 = vpow2.f32 %v3981_v26  ;;  %v5805_v28 = vunpack.i.h.bf16 %v5803_v27  ;;  %v5804_v30 = vunpack.i.l.bf16 %v5803_v27  ;;  %v5941_v27 = vld [vmem:[%s6508_s11 + $0x8] sm:$0xff] }
0x12a3   : > { %v5637_v36 = vpack.c.bf16 %v5805_v28, %v5804_v30  ;;  %v2610_v28 = vadd.f32 %v5941_v27, %v6805_v62  ;;  %v5942_v30 = vld [vmem:[%s6508_s11 + $0x18] sm:$0xff]  ;;  %s6095_s11 = scalar_lea.vmem %s6094_s16, 1024 }
0x12a4   : > { %v5813_v13 = vpop.permute.xlu1 %5812  ;;  %v2612_v34 = vadd.f32 %v5942_v30, %v6810_v0  ;;  %p6097_p6 = scmp.lt.s32.totalorder %s6095_s11, %s6089_s12 }
0x12a5   : > { %5638 = vmatpush3.bf16.msra.mxu0 %v5637_v36  ;;  %v5815_v47 = vunpack.i.h.bf16 %v5813_v13  ;;  %v5814_v48 = vunpack.i.l.bf16 %v5813_v13  ;;  %v2616_v36 = vsel %vm404_vm0, %v2610_v28, 0.0 }
0x12a6   : > { %5639 = vmatprep.subr.bf16.mxu0 %v6211_v11  ;;  %p6098_p10 = por %p6097_p6, %p6096_p8 }
0x12a8   : > { %5505 = vmatmul.mubr.msk.f32.vlgmr.msra.gmra.mrb[34].mxu0 %vm3128_vm4, %v3991_v37  ;;  %v5818_v53 = vpop.permute.xlu1 %5817  ;;  %v2622_v37 = vsel %vm404_vm0, %v2612_v34, 0.0  ;;  %p6099_p3 = pnand %p6098_p10, %p6092_p0 }
0x12a9   : > { %5511 = vmatprep.mubr.msk.f32.mxu0 %vm6212_vm2, %v6213_v61  ;;  %v5820_v55 = vunpack.i.h.bf16 %v5818_v53  ;;  %v5819_v56 = vunpack.i.l.bf16 %v5818_v53 }
0x12ab   : > { %v5916_v12 = vpop.eup %5915  ;;  %v5647_v57 = vpack.c.bf16 %v5820_v55, %v5819_v56 }
0x12ac   : > { %v3986_v23 = vsel %vm3128_vm4, %v5916_v12, 0.0  ;;  %v4317_v60 = vpop.permute.xlu1 %4316 }
0x12ad   : > { %3987 = vadd.xlane.f32.xlu0 %v3986_v23 }
0x12c3   : > { %5807 = vrot.lane.b32.xlu0 %v6845_v31, %s6209_s30 }
0x12c7   : > { %4234 = vrot.lane.b32.xlu0 %v6827_v50, %s6210_s17  ;;  %v5643_v50 = vpack.c.bf16 %v5815_v47, %v5814_v48 }
0x133a   : > { %v3988_v39 = vpop.xlane.xlu0 %3987 }
0x133b   : > { %5917 = vrcp.f32 %v3988_v39 }
0x133e   : > { %v5808_v32 = vpop.permute.xlu0 %5807 }
0x133f   : > { %v5810_v33 = vunpack.i.h.bf16 %v5808_v32  ;;  %v5809_v44 = vunpack.i.l.bf16 %v5808_v32 }
0x1341   : > { %v5640_v45 = vpack.c.bf16 %v5810_v33, %v5809_v44  ;;  %v2704_v33 = vld [vmem:[#allocation8 + $0x78] sm:$0xff] }
0x1342   : > { %v4235_v51 = vpop.permute.xlu0 %4234 }
0x1343   : > { %5641 = vmatpush3.bf16.msra.mxu0 %v5640_v45 }
0x1344   : > { %5642 = vmatprep.subr.bf16.mxu0 %v6211_v11 }
0x1345   : > { %v5918_v46 = vpop.eup %5917 }
0x1346   : > { %v3992_v49 = vmul.f32 %v5918_v46, %v5916_v12 }
0x1348   : > { %5512 = vmatmul.mubr.msk.f32.vlgmr.msra.gmra.mrb[36].mxu0 %vm3128_vm4, %v3992_v49 }
0x1349   : > { %5523 = vmatprep.mubr.msk.f32.mxu0 %vm6212_vm2, %v6213_v61 }
0x134c   : > { %5645 = vmatpush3.bf16.xpose.msk.msra.mxu0 %vm6816_vm3, %v5643_v50 }
0x134d   : > { %5650 = vmatprep.subr.bf16.mxu0 %v6211_v11 }
0x1353   : > { %5524 = vmatmul.mubr.msk.f32.vlgmr.msra.gmra.mrb[38].mxu0 %vm670_vm1, %v4235_v51  ;;  %v5045_v51 = vld [vmem:[#allocation10 + $0xb] ss:$0 sm:$0xff] }
0x1354   : > { %5537 = vmatprep.mubr.msk.f32.mxu0 %vm6212_vm2, %v6213_v61 }
0x137b   : > { %v4068_v52 = vpop.f32.mrb[34].mxu0 }
0x137c   : > { %v5506_v15 = vpop.f32.mrb[35].mxu0  ;;  %5516 = vmatprep.mubr.msk.f32.mxu1 %vm670_vm1, %v4068_v52 }
0x141b   : > { %v4147_v58 = vpop.f32.mrb[36].mxu0 }
0x141c   : > { %v5513_v59 = vpop.f32.mrb[37].mxu0  ;;  %5517 = vmatmul.mubr.msk.f32.vlgmr.msra.gmra.mrb[38].mxu1 %vm670_vm1, %v4147_v58 }
0x141d   : > { %5649 = vmatpush3.bf16.xpose.msk.msra.mxu1 %vm6816_vm3, %v5647_v57  ;;  %5530 = vmatprep.mubr.msk.f32.mxu1 %vm6212_vm2, %v6213_v61 }
0x141e   : > { %5653 = vmatprep.subr.bf16.mxu1 %v6211_v11 }
0x1424   : > { %5531 = vmatmul.mubr.msk.f32.vlgmr.msra.gmra.mrb[42].mxu1 %vm670_vm1, %v4317_v60 }
0x1425   : > { %5544 = vmatprep.mubr.msk.f32.mxu1 %vm6212_vm2, %v6213_v61  ;;  %v2605_v61 = vadd.f32 %v6802_v14, %v6807_v35 }
0x1426   : > { %v4312_v40 = vpop.f32.mrb[38].mxu0 }
0x1427   : > { %v5525_v16 = vpop.f32.mrb[39].mxu0  ;;  %v4398_v41 = vsel %vm3128_vm4, %v4312_v40, -inf  ;;  %v6972_v10 = vadd.f32 %v5939_v19, %v2605_v61 }
0x1428   : > { %4399 = vmax.xlane.f32.xlu0 %v4398_v41  ;;  %v5944_v41 = vld [vmem:[%s6518_s9] sm:$0xff] }
0x1429   : > { %v2613_v20 = vsel %vm404_vm0, %v6972_v10, 0.0 }
0x14b5   : > { %v4400_v1 = vpop.xlane.xlu0 %4399 }
0x14b6   : > { %v4404_v6 = vsub.f32 %v4312_v40, %v4400_v1  ;;  %v5943_v40 = vld [vmem:[%s6518_s9 + $0x8] sm:$0xff] }
0x14b8   : > { %v4406_v42 = vmul.f32 1.442695, %v4404_v6 }
0x14ba   : > { %5919 = vpow2.f32 %v4406_v42 }
0x14c4   : > { %v5920_v43 = vpop.eup %5919 }
0x14c5   : > { %v4410_v11 = vsel %vm3128_vm4, %v5920_v43, 0.0 }
0x14c6   : > { %4411 = vadd.xlane.f32.xlu0 %v4410_v11 }
0x14f7   : > { %v4394_v2 = vpop.f32.mrb[42].mxu1 }
0x14f8   : > { %v5532_v5 = vpop.f32.mrb[43].mxu1  ;;  %v4401_v7 = vsel %vm3128_vm4, %v4394_v2, -inf }
0x14f9   : > { %4402 = vmax.xlane.f32.xlu1 %v4401_v7 }
0x150a   : > { %5822 = vrot.lane.b32.xlu1 %v6843_v29, %s6210_s17 }
0x152e   : > { %2614 = vadd.xlane.f32.xlu1 %v2613_v20 }
0x1532   : > { %2620 = vadd.xlane.f32.xlu1 %v2619_v8 }
0x1553   : > { %v4412_v29 = vpop.xlane.xlu0 %4411 }
0x1554   : > { %5921 = vrcp.f32 %v4412_v29 }
0x155e   : > { %v5922_v54 = vpop.eup %5921 }
0x155f   : > { %v4418_v24 = vmul.f32 %v5922_v54, %v5920_v43 }
0x1586   : > { %v4403_v35 = vpop.xlane.xlu1 %4402 }
0x1587   : > { %v4405_v22 = vsub.f32 %v4394_v2, %v4403_v35 }
0x1589   : > { %v4408_v14 = vmul.f32 1.442695, %v4405_v22 }
0x158a   : > { %v5823_v17 = vpop.permute.xlu1 %5822 }
0x158b   : > { %5923 = vpow2.f32 %v4408_v14  ;;  %v5825_v3 = vunpack.i.h.bf16 %v5823_v17  ;;  %v5824_v4 = vunpack.i.l.bf16 %v5823_v17 }
0x158d   : > { %v5651_v38 = vpack.c.bf16 %v5825_v3, %v5824_v4 }
0x158f   : > { %5652 = vmatpush3.bf16.msra.mxu0 %v5651_v38 }
0x1592   : > { %5538 = vmatmul.mubr.msk.f32.vlgmr.msra.gmra.mrb[40].mxu0 %vm3128_vm4, %v4418_v24 }
0x1595   : > { %v5924_v25 = vpop.eup %5923 }
0x1596   : > { %v4413_v26 = vsel %vm3128_vm4, %v5924_v25, 0.0 }
0x1597   : > { %4414 = vadd.xlane.f32.xlu0 %v4413_v26 }
0x15ad   : > { %5827 = vrot.lane.b32.xlu0 %v6845_v31, %s6210_s17 }
0x15bb   : > { %v2615_v47 = vpop.xlane.xlu1 %2614 }
0x15bc   : > { %v2626_v49 = vmul.f32 0.03125, %v2615_v47 }
0x15be   : > { %v2630_v58 = vsub.f32 %v6972_v10, %v2626_v49 }
0x15bf   : > { %v2621_v52 = vpop.xlane.xlu1 %2620 }
0x15c0   : > { %v2628_v59 = vmul.f32 0.03125, %v2621_v52  ;;  %v2634_v5 = vmul.f32 %v2630_v58, %v2630_v58 }
0x15c2   : > { %v2632_v11 = vsub.f32 %v6977_v63, %v2628_v59  ;;  %v2638_v18 = vsel %vm404_vm0, %v2634_v5, 0.0 }
0x15c4   : > { %v2636_v19 = vmul.f32 %v2632_v11, %v2632_v11 }
0x15c6   : > { %v2644_v20 = vsel %vm404_vm0, %v2636_v19, 0.0 }
0x15cc   : > { %2617 = vadd.xlane.f32.xlu0 %v2616_v36 }
0x15d0   : > { %2623 = vadd.xlane.f32.xlu0 %v2622_v37 }
0x1624   : > { %v4415_v12 = vpop.xlane.xlu0 %4414 }
0x1625   : > { %5925 = vrcp.f32 %v4415_v12 }
0x1628   : > { %v5828_v23 = vpop.permute.xlu0 %5827 }
0x1629   : > { %v5830_v9 = vunpack.i.h.bf16 %v5828_v23  ;;  %v5829_v39 = vunpack.i.l.bf16 %v5828_v23 }
0x162b   : > { %v5654_v32 = vpack.c.bf16 %v5830_v9, %v5829_v39  ;;  %v4990_v9 = vld [vmem:[#allocation10 + $0x4] ss:$0 sm:$0xff] }
0x162d   : > { %5655 = vmatpush3.bf16.msra.mxu1 %v5654_v32 }
0x162e   : > { %5547 = vmatprep.subr.mxu1 %v2704_v33 }
0x162f   : > { %v5926_v31 = vpop.eup %5925 }
0x1630   : > { %v4419_v62 = vmul.f32 %v5926_v31, %v5924_v25 }
0x1632   : > { %5545 = vmatmul.mubr.msk.f32.vlgmr.msra.gmra.mrb[44].mxu1 %vm3128_vm4, %v4419_v62 }
0x1633   : > { %5548 = vmatpush3.msra.mxu1 %v2704_v33  ;;  %v4991_v33 = vld [vmem:[#allocation10 + $0x5] ss:$0 sm:$0xff] }
0x1659   : > { %v2618_v46 = vpop.xlane.xlu0 %2617 }
0x165a   : > { %v2627_v48 = vmul.f32 0.03125, %v2618_v46 }
0x165c   : > { %v2631_v53 = vsub.f32 %v2610_v28, %v2627_v48 }
0x165d   : > { %v2624_v50 = vpop.xlane.xlu0 %2623 }
0x165e   : > { %v2629_v55 = vmul.f32 0.03125, %v2624_v50  ;;  %v2635_v43 = vmul.f32 %v2631_v53, %v2631_v53 }
0x1660   : > { %v2633_v6 = vsub.f32 %v2612_v34, %v2629_v55  ;;  %v2641_v7 = vsel %vm404_vm0, %v2635_v43, 0.0 }
0x1662   : > { %v2637_v61 = vmul.f32 %v2633_v6, %v2633_v6 }
0x1664   : > { %v2647_v10 = vsel %vm404_vm0, %v2637_v61, 0.0 }
0x1665   : > { %v4495_v0 = vpop.f32.mrb[40].mxu0 }
0x1666   : > { %v5539_v44 = vpop.f32.mrb[41].mxu0  ;;  %5549 = vmatprep.mubr.msk.f32.mxu1 %vm670_vm1, %v4495_v0 }
0x1705   : > { %v4574_v45 = vpop.f32.mrb[44].mxu1 }
0x1706   : > { %v5546_v13 = vpop.f32.mrb[45].mxu1  ;;  %5550 = vmatmul.mubr.msk.f32.vlgmr.msra.gmra.mrb[38].mxu1 %vm670_vm1, %v4574_v45 }
0x17d9   : > { %v5551_v15 = vpop.f32.mrb[38].mxu1 }
0x17da   : > { %v4666_v56 = vadd.f32 %v5551_v15, %v5045_v51  ;;  %v4650_v57 = vpop.f32.mrb[39].mxu1 }
0x17db   : > { %v4665_v60 = vadd.f32 %v5045_v51, %v4650_v57 }
0x17dc   : > { %v4668_v16 = vadd.f32 %v5943_v40, %v4666_v56 }
0x17dd   : > { %v4667_v1 = vadd.f32 %v5944_v41, %v4665_v60 }
0x17de   : > { %v4672_v42 = vsel %vm404_vm0, %v4668_v16, 0.0 }
0x17df   : > { %4673 = vadd.xlane.f32.xlu0 %v4672_v42  ;;  %v4669_v2 = vsel %vm404_vm0, %v4667_v1, 0.0 }
0x17e0   : > { %4670 = vadd.xlane.f32.xlu1 %v4669_v2 }
0x17e3   : > { %2642 = vadd.xlane.f32.xlu0 %v2641_v7 }
0x17e4   : > { %2639 = vadd.xlane.f32.xlu1 %v2638_v18 }
0x17e7   : > { %2648 = vadd.xlane.f32.xlu0 %v2647_v10 }
0x17e8   : > { %2645 = vadd.xlane.f32.xlu1 %v2644_v20 }
0x186c   : > { %v4674_v21 = vpop.xlane.xlu0 %4673 }
0x186d   : > { %v4676_v63 = vmul.f32 0.03125, %v4674_v21  ;;  %v4671_v8 = vpop.xlane.xlu1 %4670 }
0x186e   : > { %v4675_v29 = vmul.f32 0.03125, %v4671_v8 }
0x186f   : > { %v7004_v35 = vsub.f32 %v4668_v16, %v4676_v63 }
0x1870   : > { %v7006_v22 = vsub.f32 %v4667_v1, %v4675_v29  ;;  %v2643_v14 = vpop.xlane.xlu0 %2642 }
0x1871   : > { %v2651_v17 = vmul.f32 0.03125, %v2643_v14  ;;  %v2640_v3 = vpop.xlane.xlu1 %2639  ;;  %v4680_v4 = vmul.f32 %v7004_v35, %v7004_v35 }
0x1872   : > { %v2650_v54 = vmul.f32 0.03125, %v2640_v3  ;;  %v4679_v38 = vmul.f32 %v7006_v22, %v7006_v22 }
0x1873   : > { %v2655_v24 = vadd.f32 1e-05, %v2651_v17  ;;  %v4684_v25 = vsel %vm404_vm0, %v4680_v4, 0.0 }
0x1874   : > { %v2654_v26 = vadd.f32 1e-05, %v2650_v54  ;;  %4685 = vadd.xlane.f32.xlu0 %v4684_v25  ;;  %v2649_v27 = vpop.xlane.xlu0 %2648  ;;  %v4681_v28 = vsel %vm404_vm0, %v4679_v38, 0.0 }
0x1875   : > { %5927 = vrsqrt.f32 %v2655_v24  ;;  %v2653_v30 = vmul.f32 0.03125, %v2649_v27  ;;  %4682 = vadd.xlane.f32.xlu1 %v4681_v28  ;;  %v2646_v34 = vpop.xlane.xlu1 %2645 }
0x1876   : > { %5929 = vrsqrt.f32 %v2654_v26  ;;  %v2652_v36 = vmul.f32 0.03125, %v2646_v34 }
0x1877   : > { %v2657_v37 = vadd.f32 1e-05, %v2653_v30 }
0x1878   : > { %v2656_v12 = vadd.f32 1e-05, %v2652_v36 }
0x1879   : > { %5931 = vrsqrt.f32 %v2657_v37 }
0x187a   : > { %5933 = vrsqrt.f32 %v2656_v12 }
0x187f   : > { %v5928_v23 = vpop.eup %5927 }
0x1880   : > { %v5930_v39 = vpop.eup %5929  ;;  %v2663_v32 = vmul.f32 %v5928_v23, %v2631_v53 }
0x1881   : > { %v2662_v31 = vmul.f32 %v5930_v39, %v2630_v58 }
0x1882   : > { %v2671_v62 = vmul.f32 %v4990_v9, %v2663_v32 }
0x1883   : > { %v5932_v0 = vpop.eup %5931  ;;  %v2670_v44 = vmul.f32 %v4990_v9, %v2662_v31 }
0x1884   : > { %v5934_v45 = vpop.eup %5933  ;;  %v2679_v13 = vadd.f32 %v4991_v33, %v2671_v62  ;;  %v2665_v46 = vmul.f32 %v5932_v0, %v2633_v6 }
0x1885   : > { %v2678_v47 = vadd.f32 %v4991_v33, %v2670_v44  ;;  %v2664_v48 = vmul.f32 %v5934_v45, %v2632_v11 }
0x1886   : > { %v2673_v49 = vmul.f32 %v4990_v9, %v2665_v46  ;;  %2683 = vst.msk [vmem:[%s357_s26 + $0x8] sm:$0xff] %vm404_vm0, %v2679_v13 }
0x1887   : > { %v2672_v50 = vmul.f32 %v4990_v9, %v2664_v48  ;;  %2682 = vst.msk [vmem:[%s357_s26] sm:$0xff] %vm404_vm0, %v2678_v47 }
0x1888   : > { %v2681_v51 = vadd.f32 %v4991_v33, %v2673_v49 }
0x1889   : > { %v2680_v52 = vadd.f32 %v4991_v33, %v2672_v50 }
0x188a   : > { %2685 = vst.msk [vmem:[%s357_s26 + $0x18] sm:$0xff] %vm404_vm0, %v2681_v51 }
0x188b   : > { %2684 = vst.msk [vmem:[%s357_s26 + $0x10] sm:$0xff] %vm404_vm0, %v2680_v52 }
0x188c   : > { %6102 = shalt.err (!%p6099_p3)
}
0x188d   : > { %s6103_s0 = scalar_lea.hbm %s7024_s2, 512  ;;  %s6107_s27 = scalar_lea.hbm %s7119_s5, 1024 }
0x188e   : > { %p6104_p9 = scmp.ne.s32.totalorder %s7024_s2, %s6103_s0  ;;  %p6108_p7 = scmp.lt.u32.totalorder %s7024_s2, %s7119_s5 }
0x188f   : > { %p6109_p12 = scmp.lt.u32.totalorder %s6107_s27, %s6103_s0  ;;  %p6111_p2 = scmp.lt.u32.totalorder %s6103_s0, %s7024_s2 }
0x1890   : > { %p6105_p13 = pnand %p6104_p9, %p6407_p5 }
0x1891   : > { %p6110_p1 = por %p6109_p12, %p6108_p7 }
0x1892   : > { %p6106_p11 = pneg %p6105_p13 }
0x1893   : > { %p6112_p4 = por %p6111_p2, %p6110_p1 }
0x1895   : > { %p6113_p0 = pnand %p6112_p4, %p6106_p11 }
0x1897   : > { %6116 = shalt.err (!%p6113_p0)
}
0x1898   : > { %s6215_s26 = smov 128   ;;  %s6216_s10 = smov 8   ;;  %v5046_v60 = vld [vmem:[#allocation10 + $0xc] ss:$0 sm:$0xff]  ;;  %v5047_v41 = vld [vmem:[#allocation10 + $0xd] ss:$0 sm:$0xff] }
0x1899   : > { %5690 = dma.vmem_to_hbm [thread:$0]  (%p6407_p5), %s7026_s19, 512, %s7024_s2, %s4710_s8, %s6215_s26, %s6215_s26, %s6216_s10  }
0x189a   : > { %s5062_s13 = sshll.u32 %s6274_s25, 8  ;;  %s364_s7 = scalar_lea.vmem [#allocation12], %s4916_s3 }
0x189b   : > { %s4745_s2 = sshll.u32 %s364_s7, 4  ;;  %s7063_s12 = scalar_lea.hbm %s7120_s6, %s5062_s13  ;;  %s7065_s2 = int_to_ptr.vmem [resolvable:$true] %s4745_s2 }
0x189c   : > { %s4715_s25 = scalar_lea.sflag [#allocation13], %s6502_s4  ;;  %s6117_s3 = scalar_lea.vmem %s7065_s2, 256 }
0x189d   : > { %p6118_p8 = scmp.ne.s32.totalorder %s7065_s2, %s6117_s3  ;;  %s6217_s20 = smov [#allocation12]  }
0x189e   : > { %s6121_s16 = sshll.u32 %s6217_s20, 4  ;;  %s6122_s16 = int_to_ptr.vmem [resolvable:$false] %s6121_s16 }
0x189f   : > { %p6119_p6 = pnand %p6118_p8, %p6407_p5  ;;  %s6123_s11 = scalar_lea.vmem %s6122_s16, 512 }
0x18a0   : > { %p6124_p3 = scmp.lt.s32.totalorder %s7065_s2, %s6122_s16  ;;  %p6125_p9 = scmp.lt.s32.totalorder %s6123_s11, %s6117_s3 }
0x18a1   : > { %p6120_p10 = pneg %p6119_p6 }
0x18a2   : > { %p6126_p13 = por %p6125_p9, %p6124_p3 }
0x18a4   : > { %p6127_p11 = pnand %p6126_p13, %p6120_p10 }
0x1901   : > { %v4686_v15 = vpop.xlane.xlu0 %4685 }
0x1902   : > { %v4688_v53 = vmul.f32 0.03125, %v4686_v15  ;;  %v4683_v55 = vpop.xlane.xlu1 %4682 }
0x1903   : > { %v4687_v56 = vmul.f32 0.03125, %v4683_v55 }
0x1904   : > { %v4690_v57 = vadd.f32 1e-05, %v4688_v53 }
0x1905   : > { %v4689_v58 = vadd.f32 1e-05, %v4687_v56 }
0x1906   : > { %5935 = vrsqrt.f32 %v4690_v57 }
0x1907   : > { %5937 = vrsqrt.f32 %v4689_v58 }
0x1910   : > { %v5936_v59 = vpop.eup %5935 }
0x1911   : > { %v5938_v40 = vpop.eup %5937  ;;  %v4694_v16 = vmul.f32 %v5936_v59, %v7004_v35 }
0x1912   : > { %v4693_v1 = vmul.f32 %v5938_v40, %v7006_v22 }
0x1913   : > { %v4700_v6 = vmul.f32 %v5046_v60, %v4694_v16 }
0x1914   : > { %v4699_v42 = vmul.f32 %v5046_v60, %v4693_v1 }
0x1915   : > { %v4706_v43 = vadd.f32 %v5047_v41, %v4700_v6 }
0x1916   : > { %v4705_v11 = vadd.f32 %v5047_v41, %v4699_v42 }
0x1917   : > { %4708 = vst.msk [vmem:[%s364_s7 + $0x8] sm:$0xff] %vm404_vm0, %v4706_v43 }
0x1918   : > { %4707 = vst.msk [vmem:[%s364_s7] sm:$0xff] %vm404_vm0, %v4705_v11 }
0x1919   : > { %6130 = shalt.err (!%p6127_p11)
}
0x191a   : > { %s6131_s0 = scalar_lea.hbm %s7063_s12, 256  ;;  %s6135_s27 = scalar_lea.hbm %s7120_s6, 512 }
0x191b   : > { %p6132_p7 = scmp.ne.s32.totalorder %s7063_s12, %s6131_s0  ;;  %p6136_p2 = scmp.lt.u32.totalorder %s7063_s12, %s7120_s6 }
0x191c   : > { %p6137_p4 = scmp.lt.u32.totalorder %s6135_s27, %s6131_s0  ;;  %p6139_p8 = scmp.lt.u32.totalorder %s6131_s0, %s7063_s12 }
0x191d   : > { %p6133_p12 = pnand %p6132_p7, %p6407_p5 }
0x191e   : > { %p6138_p0 = por %p6137_p4, %p6136_p2 }
0x191f   : > { %p6134_p1 = pneg %p6133_p12 }
0x1920   : > { %p6140_p6 = por %p6139_p8, %p6138_p0 }
0x1922   : > { %p6141_p10 = pnand %p6140_p6, %p6134_p1 }
0x1924   : > { %6144 = shalt.err (!%p6141_p10)
}
0x1925   : > { %5691 = dma.vmem_to_hbm [thread:$0]  (%p6407_p5), %s7065_s2, 256, %s7063_s12, %s4715_s25, %s6215_s26, %s6215_s26, %s6216_s10  }
0x1926 PF: > { %s4760_s13 = sand.u32 1, %s6187_s21   ;;  %p7152_p3 = scmp.ne.s32.totalorder %s7131_s28, 0 }
0x1927   : > { %p7153_p9 = scmp.ge.s32.totalorder %s6199_s24, 2  ;;  %s4761_s7 = scalar_lea.sflag [#allocation4], %s4760_s13 }
0x1929   : > { %p5712_p13 = pnand %p7153_p9, %p7152_p3 }
0x192b   : > { %6178 = dma.done.wait (!%p5712_p13), %s4761_s7, 512  }
0x192c   : > { %6180 = vsyncadd (!%p5712_p13), %s4761_s7, 4294966784  ;;  %s4770_s15 = scalar_lea.sflag [#allocation13], %s4760_s13 }
0x192d   : > { %6182 = dma.done.wait (!%p5712_p13), %s4770_s15, 256  }
0x192e   : > { %6184 = vsyncadd (!%p5712_p13), %s4770_s15, 4294967040  ;;  %p27_p5 = scmp.ge.s32.totalorder %s6393_s18, 4   ;;  %s7154_s21 = smov %s6191_s22 }
0x192f   : > { %s7155_s22 = smov %s6195_s23  ;;  %s7156_s23 = smov %s6403_s14 }
0x1930   : > { %s7157_s24 = smov %s6393_s18  ;;  %29 = sbr.rel (!%p27_p5) target bundleno = 15 (0xf), region = 133 }
0x1937   :  { %4775 = vsyncpa [#allocation3], 1 }
0x1938   :  { %4777 = vsyncpa [#allocation3 + $0x1], 1 }
0x1939   :  { %4778 = vsyncpa [#allocation6], 1 }
0x193a   :  { %4780 = vsyncpa [#allocation6 + $0x1], 1 }
0x193b   :  { %4781 = vsyncpa [#allocation9], 1 }
0x193c   :  { %4782 = vsyncpa [#allocation4], 1 }
0x193d   :  { %4784 = vsyncpa [#allocation4 + $0x1], 1 }
0x193e   :  { %4785 = vsyncpa [#allocation13], 1 }
0x193f   :  { %4787 = vsyncpa [#allocation13 + $0x1], 1 }

</bundles_post_ra>
